<compile_context>
chip_gen: v7x
topology: tpu7x:2x2x1
jax: 0.10.0
libtpu: 0.0.40
codegen_flags: <defaults>
</compile_context>

<pallas_src>
import math
import functools

import jax
import jax.numpy as jnp
from jax.experimental import pallas as pl
from jax.experimental.pallas import tpu as pltpu


# ---------------------------------------------------------------------------
# Pallas kernel 1: "banded" convolution.
#   For a valid NHWC conv with stride 1, output row block ho:
#     out[ho, wo*O + o] = sum_i  x[ho+i, :] @ Wband[i]
#   where Wband[i][w*C + c, wo*O + o] = g[o, c, i, w - wo]  (0 <= w-wo < kw).
#   kh small GEMMs per batch item; activations are read from HBM exactly once.
# ---------------------------------------------------------------------------
def _banded_conv_kernel(x_ref, w_ref, o_ref):
    kh = w_ref.shape[0]
    ho = o_ref.shape[1]
    xb = x_ref[0]                                   # (H, W*Cin) bf16
    acc = jnp.zeros(o_ref.shape[1:], jnp.float32)   # (Ho, Wo*O) f32 accumulator
    for i in range(kh):                             # static unroll over row taps
        acc = acc + jnp.dot(xb[i:i + ho, :], w_ref[i],
                            preferred_element_type=jnp.float32)
    o_ref[0] = acc.astype(o_ref.dtype)


def banded_conv(x, wband):
    """x: (N, H, W*Cin) bf16; wband: (kh, W*Cin, Wo*O) bf16 -> (N, Ho, Wo*O) bf16."""
    N, H, WC = x.shape
    kh, WC2, WoO = wband.shape
    assert WC == WC2
    Ho = H - kh + 1
    return pl.pallas_call(
        _banded_conv_kernel,
        out_shape=jax.ShapeDtypeStruct((N, Ho, WoO), jnp.bfloat16),
        grid_spec=pltpu.PrefetchScalarGridSpec(
            num_scalar_prefetch=0,
            grid=(N,),
            in_specs=[
                pl.BlockSpec((1, H, WC), lambda n: (n, 0, 0)),
                pl.BlockSpec((kh, WC, WoO), lambda n: (0, 0, 0)),
            ],
            out_specs=pl.BlockSpec((1, Ho, WoO), lambda n: (n, 0, 0)),
        ),
        compiler_params=pltpu.CompilerParams(dimension_semantics=("parallel",)),
    )(x, wband)


def banded_weights(g, Wi, Wo):
    """LogGabor filters (O, Cin, kh, kw) -> banded GEMM weights (kh, Wi*Cin, Wo*O)."""
    O, Cin, kh, kw = g.shape
    w_idx = jnp.arange(Wi)[:, None, None]
    wo_idx = jnp.arange(Wo)[None, :, None]
    j_idx = jnp.arange(kw)[None, None, :]
    sel = (w_idx == wo_idx + j_idx).astype(g.dtype)       # (Wi, Wo, kw)
    wband = jnp.einsum('ocij,wvj->iwcvo', g, sel)         # (kh, Wi, Cin, Wo, O)
    return wband.reshape(kh, Wi * Cin, Wo * O)


# ---------------------------------------------------------------------------
# Pallas kernel 2: fused  resize + 1x1-fusion-conv + bias/BN(eval)/ReLU
#                  + ChannelAttention  — one program per batch item.
# ---------------------------------------------------------------------------
def _fusion_attention_kernel(xf_ref, xs_ref, r_ref, wf_ref, ws_ref,
                             scale_ref, shift_ref,
                             w1_ref, w2_ref, w3_ref, w4_ref, o_ref):
    xf = xf_ref[0]                                          # (Hf*Wf, O) bf16
    xs = xs_ref[0]                                          # (Hs*Ws, O) bf16

    # bilinear resize of the freq branch, expressed as a matmul
    xf_rs = jnp.dot(r_ref[...], xf,
                    preferred_element_type=jnp.float32)     # (Hs*Ws, O) f32

    # fusion 1x1 conv as two accumulated GEMM halves (no concat)
    acc = jnp.dot(xf_rs.astype(jnp.bfloat16), wf_ref[...],
                  preferred_element_type=jnp.float32)
    acc = acc + jnp.dot(xs, ws_ref[...],
                        preferred_element_type=jnp.float32)

    # conv-bias + BatchNorm(eval) + ReLU folded into a per-channel affine (f32)
    fused = jnp.maximum(acc * scale_ref[...] + shift_ref[...], 0.0)   # (Hs*Ws, O)

    # ChannelAttention: global avg & max pool over spatial rows, two tiny MLPs,
    # sigmoid gate, multiply.
    avg = jnp.mean(fused, axis=0, keepdims=True)            # (1, O)
    mx = jnp.max(fused, axis=0, keepdims=True)              # (1, O)
    a_out = jnp.dot(
        jnp.maximum(jnp.dot(avg, w1_ref[...], preferred_element_type=jnp.float32), 0.0),
        w2_ref[...], preferred_element_type=jnp.float32)
    m_out = jnp.dot(
        jnp.maximum(jnp.dot(mx, w3_ref[...], preferred_element_type=jnp.float32), 0.0),
        w4_ref[...], preferred_element_type=jnp.float32)
    att = jax.nn.sigmoid(a_out + m_out)                     # (1, O)

    o_ref[0] = (fused * att).astype(o_ref.dtype)


def fusion_attention(xf, xs, R, wf, ws, scale, shift, w1t, w2t, w3t, w4t):
    N, HfWf, O = xf.shape
    _, HsWs, _ = xs.shape
    Cr = w1t.shape[1]
    rep = lambda n: (0, 0)
    return pl.pallas_call(
        _fusion_attention_kernel,
        out_shape=jax.ShapeDtypeStruct((N, HsWs, O), jnp.float32),
        grid_spec=pltpu.PrefetchScalarGridSpec(
            num_scalar_prefetch=0,
            grid=(N,),
            in_specs=[
                pl.BlockSpec((1, HfWf, O), lambda n: (n, 0, 0)),
                pl.BlockSpec((1, HsWs, O), lambda n: (n, 0, 0)),
                pl.BlockSpec((HsWs, HfWf), rep),
                pl.BlockSpec((O, O), rep),
                pl.BlockSpec((O, O), rep),
                pl.BlockSpec((1, O), rep),
                pl.BlockSpec((1, O), rep),
                pl.BlockSpec((O, Cr), rep),
                pl.BlockSpec((Cr, O), rep),
                pl.BlockSpec((O, Cr), rep),
                pl.BlockSpec((Cr, O), rep),
            ],
            out_specs=pl.BlockSpec((1, HsWs, O), lambda n: (n, 0, 0)),
        ),
        compiler_params=pltpu.CompilerParams(dimension_semantics=("parallel",)),
    )(xf, xs, R, wf, ws, scale, shift, w1t, w2t, w3t, w4t)


# ---------------------------------------------------------------------------
# LogGabor filter-bank generation (matches LogGaborConv2d.calculate_weights,
# vectorized over (out_ch, in_ch)).  Parameter-setup glue.
# ---------------------------------------------------------------------------
def loggabor_weights(p, kh, kw):
    x0 = math.ceil(kh / 2)
    y0 = math.ceil(kw / 2)
    ygrid = jnp.linspace(-x0 + 1.0, float(x0), kh)
    xgrid = jnp.linspace(-y0 + 1.0, float(y0), kw)
    y = jnp.broadcast_to(ygrid[:, None], (kh, kw))
    x = jnp.broadcast_to(xgrid[None, :], (kh, kw))
    f = p['freq'][:, :, None, None]
    th = p['theta'][:, :, None, None]
    sg = p['sigma'][:, :, None, None]
    ps = p['psi'][:, :, None, None]
    f0 = p['f0']
    th0 = p['theta0']
    delta = 0.001
    rotx = x * jnp.cos(th) + y * jnp.sin(th)
    roty = -x * jnp.sin(th) + y * jnp.cos(th)
    r = jnp.sqrt(rotx ** 2 + roty ** 2 + delta)
    g_radial = jnp.exp(-((jnp.log(r) - jnp.log(f0)) /
                         (2.0 * jnp.log(sg / f0))) ** 2)
    g_angular = jnp.exp(-((th - th0) ** 2) / (2.0 * sg ** 2))
    g = g_radial * g_angular * jnp.cos(f * r + ps) / (2.0 * math.pi * sg ** 2)
    return g                                          # (O, Cin, kh, kw)


# ---------------------------------------------------------------------------
# Bilinear interpolation (align_corners=False, PyTorch semantics) as a matrix,
# so it can be fused into the GEMM kernel.
# ---------------------------------------------------------------------------
def _resize_matrix_1d(out_size, in_size):
    scale = in_size / out_size
    s = (jnp.arange(out_size, dtype=jnp.float32) + 0.5) * scale - 0.5
    s = jnp.maximum(s, 0.0)
    i0 = jnp.minimum(jnp.floor(s).astype(jnp.int32), in_size - 1)
    i1 = jnp.minimum(i0 + 1, in_size - 1)
    lam = s - i0.astype(jnp.float32)
    return (jax.nn.one_hot(i0, in_size, dtype=jnp.float32) * (1.0 - lam)[:, None]
            + jax.nn.one_hot(i1, in_size, dtype=jnp.float32) * lam[:, None])


def resize_matrix_2d(Hi, Wi, Ho, Wo):
    rh = _resize_matrix_1d(Ho, Hi)                    # (Ho, Hi)
    rw = _resize_matrix_1d(Wo, Wi)                    # (Wo, Wi)
    return jnp.einsum('ab,cd->acbd', rh, rw).reshape(Ho * Wo, Hi * Wi)


# ---------------------------------------------------------------------------
# Deterministic parameter initialization (same shapes as the PyTorch __init__).
# ---------------------------------------------------------------------------
def init_params(key, in_channels, out_channels):
    ks = jax.random.split(key, 10)
    O, C = out_channels, in_channels

    def loggab(k, o, i):
        k1, k2, k3 = jax.random.split(k, 3)
        freq = (math.pi / 2) * jnp.power(
            jnp.float32(math.sqrt(2.0)),
            -jax.random.randint(k1, (o, i), 0, 5).astype(jnp.float32))
        theta = (math.pi / 8) * jax.random.randint(k2, (o, i), 0, 8).astype(jnp.float32)
        sigma = math.pi / freq
        psi = math.pi * jax.random.uniform(k3, (o, i), dtype=jnp.float32)
        return dict(freq=freq, theta=theta, sigma=sigma, psi=psi,
                    f0=jnp.float32(1.0), theta0=jnp.float32(1.0))

    params = {
        'freq_lg': loggab(ks[0], O, 2 * C),
        'spatial_lg': loggab(ks[1], O, C),
    }
    bnd = 1.0 / math.sqrt(2 * O)
    params['fusion_w'] = jax.random.uniform(ks[2], (O, 2 * O), minval=-bnd, maxval=bnd)
    params['fusion_b'] = jax.random.uniform(ks[3], (O,), minval=-bnd, maxval=bnd)
    # BatchNorm2d running stats (inference mode).
    # TODO(synk): training-mode BatchNorm (batch statistics) not implemented.
    params['bn_gamma'] = jnp.ones((O,), jnp.float32)
    params['bn_beta'] = jnp.zeros((O,), jnp.float32)
    params['bn_mean'] = jnp.zeros((O,), jnp.float32)
    params['bn_var'] = jnp.ones((O,), jnp.float32)
    Cr = O // 2
    b1, b2 = 1.0 / math.sqrt(O), 1.0 / math.sqrt(Cr)
    params['att_w1'] = jax.random.uniform(ks[4], (Cr, O), minval=-b1, maxval=b1)
    params['att_w2'] = jax.random.uniform(ks[5], (O, Cr), minval=-b2, maxval=b2)
    params['att_w3'] = jax.random.uniform(ks[6], (Cr, O), minval=-b1, maxval=b1)
    params['att_w4'] = jax.random.uniform(ks[7], (O, Cr), minval=-b2, maxval=b2)
    return params


# ---------------------------------------------------------------------------
# Forward pass of DualDomainAttenLogGabConv2d.
# ---------------------------------------------------------------------------
def dual_domain_forward(x, params, kernel_size, freq_kernel_size):
    N, C, H, W = x.shape
    O = params['fusion_b'].shape[0]
    # The PyTorch default freq_kernel_size=768 requires inputs >= 768x768 for
    # a valid conv; this demo uses a smaller stand-in size.
    assert freq_kernel_size <= H and freq_kernel_size <= W
    assert kernel_size <= H and kernel_size <= W

    # ---- frequency branch prologue: FFT -> magnitude/phase (XLA glue) ----
    xf = jnp.fft.fft2(x)                  # over last two axes, like torch.fft.fft2
    xf = jnp.fft.fftshift(xf)             # torch.fft.fftshift default: ALL dims
    mag = jnp.abs(xf)
    ph = jnp.angle(xf)
    x_freq = jnp.concatenate([mag, ph], axis=1)                       # (N, 2C, H, W)

    # single internal layout: rows = spatial, lanes = (w, channel); bf16 MXU operands
    xfr = x_freq.transpose(0, 2, 3, 1).reshape(N, H, W * 2 * C).astype(jnp.bfloat16)
    xsr = x.transpose(0, 2, 3, 1).reshape(N, H, W * C).astype(jnp.bfloat16)

    kf, ksz = freq_kernel_size, kernel_size
    Hf, Wf = H - kf + 1, W - kf + 1
    Hs, Ws = H - ksz + 1, W - ksz + 1

    # LogGabor filter banks -> banded GEMM weights (bf16)
    g_freq = loggabor_weights(params['freq_lg'], kf, kf)              # (O, 2C, kf, kf)
    g_sp = loggabor_weights(params['spatial_lg'], ksz, ksz)           # (O, C, ks, ks)
    wband_f = banded_weights(g_freq, W, Wf).astype(jnp.bfloat16)      # (kf, W*2C, Wf*O)
    wband_s = banded_weights(g_sp, W, Ws).astype(jnp.bfloat16)        # (ks, W*C,  Ws*O)

    # LogGabor convolutions (Pallas kernel 1), one activation read per pixel
    yf = banded_conv(xfr, wband_f)                                    # (N, Hf, Wf*O) bf16
    ys = banded_conv(xsr, wband_s)                                    # (N, Hs, Ws*O) bf16
    yf = yf.reshape(N, Hf * Wf, O)                                    # same memory order
    ys = ys.reshape(N, Hs * Ws, O)

    # bilinear-resize operator (freq grid -> spatial grid) as a matrix
    R = resize_matrix_2d(Hf, Wf, Hs, Ws).astype(jnp.bfloat16)         # (Hs*Ws, Hf*Wf)

    # fusion 1x1 conv split into its freq/spatial halves (concat order: [freq, sp])
    wf_half = params['fusion_w'][:, :O].T.astype(jnp.bfloat16)        # (O, O)
    ws_half = params['fusion_w'][:, O:].T.astype(jnp.bfloat16)        # (O, O)

    # fold conv bias + BatchNorm(eval) into a per-channel affine (f32 epilogue)
    inv_std = 1.0 / jnp.sqrt(params['bn_var'] + 1e-5)
    scale = (params['bn_gamma'] * inv_std).reshape(1, O).astype(jnp.float32)
    shift = ((params['fusion_b'] - params['bn_mean']) * params['bn_gamma'] * inv_std
             + params['bn_beta']).reshape(1, O).astype(jnp.float32)

    # fused resize + fusion conv + BN/ReLU + channel attention (Pallas kernel 2)
    out = fusion_attention(
        yf, ys, R, wf_half, ws_half, scale, shift,
        params['att_w1'].T.astype(jnp.float32), params['att_w2'].T.astype(jnp.float32),
        params['att_w3'].T.astype(jnp.float32), params['att_w4'].T.astype(jnp.float32))

    # back to PyTorch NCHW at the very end (single layout change)
    return out.reshape(N, Hs, Ws, O).transpose(0, 3, 1, 2)


if __name__ == "__main__":
    key = jax.random.PRNGKey(0)
    kx, kp = jax.random.split(key)
    N, C, H, W = 2, 4, 16, 16
    O = 8
    kernel_size = 3
    freq_kernel_size = 8   # small stand-in for the default 768 so it fits 16x16 inputs

    x = jax.random.normal(kx, (N, C, H, W), dtype=jnp.float32)
    params = init_params(kp, C, O)

    fwd = jax.jit(functools.partial(dual_domain_forward,
                                    kernel_size=kernel_size,
                                    freq_kernel_size=freq_kernel_size))
    out = fwd(x, params)
    jax.block_until_ready(out)
    assert out.shape == (N, O, H - kernel_size + 1, W - kernel_size + 1)
    assert out.dtype == jnp.float32
    print("KERNEL_OK")
</pallas_src>

<mosaic_0001>
module attributes {stable_mosaic.version = 11 : i64} {
  func.func @_banded_conv_kernel(%arg0: i32, %arg1: memref<1x16x128xbf16, #tpu.memory_space<vmem>>, %arg2: memref<8x128x72xbf16, #tpu.memory_space<vmem>>, %arg3: memref<1x9x72xbf16, #tpu.memory_space<vmem>>) attributes {dimension_semantics = [#tpu.dimension_semantics<parallel>], iteration_bounds = array<i64: 2>, scalar_prefetch = 0 : i64, scratch_operands = 0 : i64, tpu.core_type = #tpu.core_type<tc>, window_params = [{transform_indices = @transform_0, window_bounds = array<i64: 1, 16, 128>}, {pipeline_mode = #tpu.pipeline_mode<synchronous>, transform_indices = @transform_1, window_bounds = array<i64: 8, 128, 72>}, {transform_indices = @transform_2, window_bounds = array<i64: 1, 9, 72>}]} {
    %c0 = arith.constant 0 : index
    %c0_0 = arith.constant 0 : index
    %c0_1 = arith.constant 0 : index
    %0 = vector.load %arg1[%c0, %c0_0, %c0_1] : memref<1x16x128xbf16, #tpu.memory_space<vmem>>, vector<1x16x128xbf16>
    %1 = vector.shape_cast %0 : vector<1x16x128xbf16> to vector<16x128xbf16>
    %cst = arith.constant 0.000000e+00 : f32
    %2 = vector.broadcast %cst : f32 to vector<9x72xf32>
    %3 = vector.extract_strided_slice %1 {offsets = [0, 0], sizes = [9, 128], strides = [1, 1]} : vector<16x128xbf16> to vector<9x128xbf16>
    %c0_2 = arith.constant 0 : index
    %c0_3 = arith.constant 0 : index
    %c0_4 = arith.constant 0 : index
    %4 = vector.load %arg2[%c0_2, %c0_3, %c0_4] : memref<8x128x72xbf16, #tpu.memory_space<vmem>>, vector<1x128x72xbf16>
    %5 = vector.shape_cast %4 : vector<1x128x72xbf16> to vector<128x72xbf16>
    %cst_5 = arith.constant dense<0.000000e+00> : vector<9x72xf32>
    %6 = tpu.matmul %3, %5, %cst_5 {dimension_numbers = #tpu.dot_dimension_numbers<[1], [0], [0], [1], [0, 0, 1, 1], [], []>} : vector<9x128xbf16>, vector<128x72xbf16>, vector<9x72xf32> -> vector<9x72xf32>
    %7 = arith.addf %2, %6 : vector<9x72xf32>
    %8 = vector.extract_strided_slice %1 {offsets = [1, 0], sizes = [9, 128], strides = [1, 1]} : vector<16x128xbf16> to vector<9x128xbf16>
    %c1 = arith.constant 1 : index
    %c0_6 = arith.constant 0 : index
    %c0_7 = arith.constant 0 : index
    %9 = vector.load %arg2[%c1, %c0_6, %c0_7] : memref<8x128x72xbf16, #tpu.memory_space<vmem>>, vector<1x128x72xbf16>
    %10 = vector.shape_cast %9 : vector<1x128x72xbf16> to vector<128x72xbf16>
    %cst_8 = arith.constant dense<0.000000e+00> : vector<9x72xf32>
    %11 = tpu.matmul %8, %10, %cst_8 {dimension_numbers = #tpu.dot_dimension_numbers<[1], [0], [0], [1], [0, 0, 1, 1], [], []>} : vector<9x128xbf16>, vector<128x72xbf16>, vector<9x72xf32> -> vector<9x72xf32>
    %12 = arith.addf %7, %11 : vector<9x72xf32>
    %13 = vector.extract_strided_slice %1 {offsets = [2, 0], sizes = [9, 128], strides = [1, 1]} : vector<16x128xbf16> to vector<9x128xbf16>
    %c2 = arith.constant 2 : index
    %c0_9 = arith.constant 0 : index
    %c0_10 = arith.constant 0 : index
    %14 = vector.load %arg2[%c2, %c0_9, %c0_10] : memref<8x128x72xbf16, #tpu.memory_space<vmem>>, vector<1x128x72xbf16>
    %15 = vector.shape_cast %14 : vector<1x128x72xbf16> to vector<128x72xbf16>
    %cst_11 = arith.constant dense<0.000000e+00> : vector<9x72xf32>
    %16 = tpu.matmul %13, %15, %cst_11 {dimension_numbers = #tpu.dot_dimension_numbers<[1], [0], [0], [1], [0, 0, 1, 1], [], []>} : vector<9x128xbf16>, vector<128x72xbf16>, vector<9x72xf32> -> vector<9x72xf32>
    %17 = arith.addf %12, %16 : vector<9x72xf32>
    %18 = vector.extract_strided_slice %1 {offsets = [3, 0], sizes = [9, 128], strides = [1, 1]} : vector<16x128xbf16> to vector<9x128xbf16>
    %c3 = arith.constant 3 : index
    %c0_12 = arith.constant 0 : index
    %c0_13 = arith.constant 0 : index
    %19 = vector.load %arg2[%c3, %c0_12, %c0_13] : memref<8x128x72xbf16, #tpu.memory_space<vmem>>, vector<1x128x72xbf16>
    %20 = vector.shape_cast %19 : vector<1x128x72xbf16> to vector<128x72xbf16>
    %cst_14 = arith.constant dense<0.000000e+00> : vector<9x72xf32>
    %21 = tpu.matmul %18, %20, %cst_14 {dimension_numbers = #tpu.dot_dimension_numbers<[1], [0], [0], [1], [0, 0, 1, 1], [], []>} : vector<9x128xbf16>, vector<128x72xbf16>, vector<9x72xf32> -> vector<9x72xf32>
    %22 = arith.addf %17, %21 : vector<9x72xf32>
    %23 = vector.extract_strided_slice %1 {offsets = [4, 0], sizes = [9, 128], strides = [1, 1]} : vector<16x128xbf16> to vector<9x128xbf16>
    %c4 = arith.constant 4 : index
    %c0_15 = arith.constant 0 : index
    %c0_16 = arith.constant 0 : index
    %24 = vector.load %arg2[%c4, %c0_15, %c0_16] : memref<8x128x72xbf16, #tpu.memory_space<vmem>>, vector<1x128x72xbf16>
    %25 = vector.shape_cast %24 : vector<1x128x72xbf16> to vector<128x72xbf16>
    %cst_17 = arith.constant dense<0.000000e+00> : vector<9x72xf32>
    %26 = tpu.matmul %23, %25, %cst_17 {dimension_numbers = #tpu.dot_dimension_numbers<[1], [0], [0], [1], [0, 0, 1, 1], [], []>} : vector<9x128xbf16>, vector<128x72xbf16>, vector<9x72xf32> -> vector<9x72xf32>
    %27 = arith.addf %22, %26 : vector<9x72xf32>
    %28 = vector.extract_strided_slice %1 {offsets = [5, 0], sizes = [9, 128], strides = [1, 1]} : vector<16x128xbf16> to vector<9x128xbf16>
    %c5 = arith.constant 5 : index
    %c0_18 = arith.constant 0 : index
    %c0_19 = arith.constant 0 : index
    %29 = vector.load %arg2[%c5, %c0_18, %c0_19] : memref<8x128x72xbf16, #tpu.memory_space<vmem>>, vector<1x128x72xbf16>
    %30 = vector.shape_cast %29 : vector<1x128x72xbf16> to vector<128x72xbf16>
    %cst_20 = arith.constant dense<0.000000e+00> : vector<9x72xf32>
    %31 = tpu.matmul %28, %30, %cst_20 {dimension_numbers = #tpu.dot_dimension_numbers<[1], [0], [0], [1], [0, 0, 1, 1], [], []>} : vector<9x128xbf16>, vector<128x72xbf16>, vector<9x72xf32> -> vector<9x72xf32>
    %32 = arith.addf %27, %31 : vector<9x72xf32>
    %33 = vector.extract_strided_slice %1 {offsets = [6, 0], sizes = [9, 128], strides = [1, 1]} : vector<16x128xbf16> to vector<9x128xbf16>
    %c6 = arith.constant 6 : index
    %c0_21 = arith.constant 0 : index
    %c0_22 = arith.constant 0 : index
    %34 = vector.load %arg2[%c6, %c0_21, %c0_22] : memref<8x128x72xbf16, #tpu.memory_space<vmem>>, vector<1x128x72xbf16>
    %35 = vector.shape_cast %34 : vector<1x128x72xbf16> to vector<128x72xbf16>
    %cst_23 = arith.constant dense<0.000000e+00> : vector<9x72xf32>
    %36 = tpu.matmul %33, %35, %cst_23 {dimension_numbers = #tpu.dot_dimension_numbers<[1], [0], [0], [1], [0, 0, 1, 1], [], []>} : vector<9x128xbf16>, vector<128x72xbf16>, vector<9x72xf32> -> vector<9x72xf32>
    %37 = arith.addf %32, %36 : vector<9x72xf32>
    %38 = vector.extract_strided_slice %1 {offsets = [7, 0], sizes = [9, 128], strides = [1, 1]} : vector<16x128xbf16> to vector<9x128xbf16>
    %c7 = arith.constant 7 : index
    %c0_24 = arith.constant 0 : index
    %c0_25 = arith.constant 0 : index
    %39 = vector.load %arg2[%c7, %c0_24, %c0_25] : memref<8x128x72xbf16, #tpu.memory_space<vmem>>, vector<1x128x72xbf16>
    %40 = vector.shape_cast %39 : vector<1x128x72xbf16> to vector<128x72xbf16>
    %cst_26 = arith.constant dense<0.000000e+00> : vector<9x72xf32>
    %41 = tpu.matmul %38, %40, %cst_26 {dimension_numbers = #tpu.dot_dimension_numbers<[1], [0], [0], [1], [0, 0, 1, 1], [], []>} : vector<9x128xbf16>, vector<128x72xbf16>, vector<9x72xf32> -> vector<9x72xf32>
    %42 = arith.addf %37, %41 : vector<9x72xf32>
    %43 = arith.truncf %42 : vector<9x72xf32> to vector<9x72xbf16>
    %c0_27 = arith.constant 0 : index
    %c0_28 = arith.constant 0 : index
    %c0_29 = arith.constant 0 : index
    %44 = vector.load %arg3[%c0_27, %c0_28, %c0_29] : memref<1x9x72xbf16, #tpu.memory_space<vmem>>, vector<1x9x72xbf16>
    %45 = vector.shape_cast %44 : vector<1x9x72xbf16> to vector<9x72xbf16>
    %46 = vector.shape_cast %43 : vector<9x72xbf16> to vector<1x9x72xbf16>
    tpu.vector_store %arg3[%c0_27, %c0_28, %c0_29], %46 {strides = array<i32>} : memref<1x9x72xbf16, #tpu.memory_space<vmem>>, vector<1x9x72xbf16>,
    return
  }
  func.func @transform_0(%arg0: i32) -> (i32, i32, i32) {
    %c0_i32 = arith.constant 0 : i32
    %c0_i32_0 = arith.constant 0 : i32
    %c0_i32_1 = arith.constant 0 : i32
    return %arg0, %c0_i32, %c0_i32_0 : i32, i32, i32
  }
  func.func @transform_1(%arg0: i32) -> (i32, i32, i32) {
    %c0_i32 = arith.constant 0 : i32
    %c0_i32_0 = arith.constant 0 : i32
    %c0_i32_1 = arith.constant 0 : i32
    %c0_i32_2 = arith.constant 0 : i32
    return %c0_i32, %c0_i32_0, %c0_i32_1 : i32, i32, i32
  }
  func.func @transform_2(%arg0: i32) -> (i32, i32, i32) {
    %c0_i32 = arith.constant 0 : i32
    %c0_i32_0 = arith.constant 0 : i32
    %c0_i32_1 = arith.constant 0 : i32
    return %arg0, %c0_i32, %c0_i32_0 : i32, i32, i32
  }
}

module attributes {stable_mosaic.version = 11 : i64} {
  func.func @_banded_conv_kernel(%arg0: i32, %arg1: memref<1x16x64xbf16, #tpu.memory_space<vmem>>, %arg2: memref<3x64x112xbf16, #tpu.memory_space<vmem>>, %arg3: memref<1x14x112xbf16, #tpu.memory_space<vmem>>) attributes {dimension_semantics = [#tpu.dimension_semantics<parallel>], iteration_bounds = array<i64: 2>, scalar_prefetch = 0 : i64, scratch_operands = 0 : i64, tpu.core_type = #tpu.core_type<tc>, window_params = [{transform_indices = @transform_0, window_bounds = array<i64: 1, 16, 64>}, {pipeline_mode = #tpu.pipeline_mode<synchronous>, transform_indices = @transform_1, window_bounds = array<i64: 3, 64, 112>}, {transform_indices = @transform_2, window_bounds = array<i64: 1, 14, 112>}]} {
    %c0 = arith.constant 0 : index
    %c0_0 = arith.constant 0 : index
    %c0_1 = arith.constant 0 : index
    %0 = vector.load %arg1[%c0, %c0_0, %c0_1] : memref<1x16x64xbf16, #tpu.memory_space<vmem>>, vector<1x16x64xbf16>
    %1 = vector.shape_cast %0 : vector<1x16x64xbf16> to vector<16x64xbf16>
    %cst = arith.constant 0.000000e+00 : f32
    %2 = vector.broadcast %cst : f32 to vector<14x112xf32>
    %3 = vector.extract_strided_slice %1 {offsets = [0, 0], sizes = [14, 64], strides = [1, 1]} : vector<16x64xbf16> to vector<14x64xbf16>
    %c0_2 = arith.constant 0 : index
    %c0_3 = arith.constant 0 : index
    %c0_4 = arith.constant 0 : index
    %4 = vector.load %arg2[%c0_2, %c0_3, %c0_4] : memref<3x64x112xbf16, #tpu.memory_space<vmem>>, vector<1x64x112xbf16>
    %5 = vector.shape_cast %4 : vector<1x64x112xbf16> to vector<64x112xbf16>
    %cst_5 = arith.constant dense<0.000000e+00> : vector<14x112xf32>
    %6 = tpu.matmul %3, %5, %cst_5 {dimension_numbers = #tpu.dot_dimension_numbers<[1], [0], [0], [1], [0, 0, 1, 1], [], []>} : vector<14x64xbf16>, vector<64x112xbf16>, vector<14x112xf32> -> vector<14x112xf32>
    %7 = arith.addf %2, %6 : vector<14x112xf32>
    %8 = vector.extract_strided_slice %1 {offsets = [1, 0], sizes = [14, 64], strides = [1, 1]} : vector<16x64xbf16> to vector<14x64xbf16>
    %c1 = arith.constant 1 : index
    %c0_6 = arith.constant 0 : index
    %c0_7 = arith.constant 0 : index
    %9 = vector.load %arg2[%c1, %c0_6, %c0_7] : memref<3x64x112xbf16, #tpu.memory_space<vmem>>, vector<1x64x112xbf16>
    %10 = vector.shape_cast %9 : vector<1x64x112xbf16> to vector<64x112xbf16>
    %cst_8 = arith.constant dense<0.000000e+00> : vector<14x112xf32>
    %11 = tpu.matmul %8, %10, %cst_8 {dimension_numbers = #tpu.dot_dimension_numbers<[1], [0], [0], [1], [0, 0, 1, 1], [], []>} : vector<14x64xbf16>, vector<64x112xbf16>, vector<14x112xf32> -> vector<14x112xf32>
    %12 = arith.addf %7, %11 : vector<14x112xf32>
    %13 = vector.extract_strided_slice %1 {offsets = [2, 0], sizes = [14, 64], strides = [1, 1]} : vector<16x64xbf16> to vector<14x64xbf16>
    %c2 = arith.constant 2 : index
    %c0_9 = arith.constant 0 : index
    %c0_10 = arith.constant 0 : index
    %14 = vector.load %arg2[%c2, %c0_9, %c0_10] : memref<3x64x112xbf16, #tpu.memory_space<vmem>>, vector<1x64x112xbf16>
    %15 = vector.shape_cast %14 : vector<1x64x112xbf16> to vector<64x112xbf16>
    %cst_11 = arith.constant dense<0.000000e+00> : vector<14x112xf32>
    %16 = tpu.matmul %13, %15, %cst_11 {dimension_numbers = #tpu.dot_dimension_numbers<[1], [0], [0], [1], [0, 0, 1, 1], [], []>} : vector<14x64xbf16>, vector<64x112xbf16>, vector<14x112xf32> -> vector<14x112xf32>
    %17 = arith.addf %12, %16 : vector<14x112xf32>
    %18 = arith.truncf %17 : vector<14x112xf32> to vector<14x112xbf16>
    %c0_12 = arith.constant 0 : index
    %c0_13 = arith.constant 0 : index
    %c0_14 = arith.constant 0 : index
    %19 = vector.load %arg3[%c0_12, %c0_13, %c0_14] : memref<1x14x112xbf16, #tpu.memory_space<vmem>>, vector<1x14x112xbf16>
    %20 = vector.shape_cast %19 : vector<1x14x112xbf16> to vector<14x112xbf16>
    %21 = vector.shape_cast %18 : vector<14x112xbf16> to vector<1x14x112xbf16>
    tpu.vector_store %arg3[%c0_12, %c0_13, %c0_14], %21 {strides = array<i32>} : memref<1x14x112xbf16, #tpu.memory_space<vmem>>, vector<1x14x112xbf16>,
    return
  }
  func.func @transform_0(%arg0: i32) -> (i32, i32, i32) {
    %c0_i32 = arith.constant 0 : i32
    %c0_i32_0 = arith.constant 0 : i32
    %c0_i32_1 = arith.constant 0 : i32
    return %arg0, %c0_i32, %c0_i32_0 : i32, i32, i32
  }
  func.func @transform_1(%arg0: i32) -> (i32, i32, i32) {
    %c0_i32 = arith.constant 0 : i32
    %c0_i32_0 = arith.constant 0 : i32
    %c0_i32_1 = arith.constant 0 : i32
    %c0_i32_2 = arith.constant 0 : i32
    return %c0_i32, %c0_i32_0, %c0_i32_1 : i32, i32, i32
  }
  func.func @transform_2(%arg0: i32) -> (i32, i32, i32) {
    %c0_i32 = arith.constant 0 : i32
    %c0_i32_0 = arith.constant 0 : i32
    %c0_i32_1 = arith.constant 0 : i32
    return %arg0, %c0_i32, %c0_i32_0 : i32, i32, i32
  }
}

module attributes {stable_mosaic.version = 11 : i64} {
  func.func @_fusion_attention_kernel(%arg0: i32, %arg1: memref<1x81x8xbf16, #tpu.memory_space<vmem>>, %arg2: memref<1x196x8xbf16, #tpu.memory_space<vmem>>, %arg3: memref<196x81xbf16, #tpu.memory_space<vmem>>, %arg4: memref<8x8xbf16, #tpu.memory_space<vmem>>, %arg5: memref<8x8xbf16, #tpu.memory_space<vmem>>, %arg6: memref<1x8xf32, #tpu.memory_space<vmem>>, %arg7: memref<1x8xf32, #tpu.memory_space<vmem>>, %arg8: memref<8x4xf32, #tpu.memory_space<vmem>>, %arg9: memref<4x8xf32, #tpu.memory_space<vmem>>, %arg10: memref<8x4xf32, #tpu.memory_space<vmem>>, %arg11: memref<4x8xf32, #tpu.memory_space<vmem>>, %arg12: memref<1x196x8xf32, #tpu.memory_space<vmem>>) attributes {dimension_semantics = [#tpu.dimension_semantics<parallel>], iteration_bounds = array<i64: 2>, scalar_prefetch = 0 : i64, scratch_operands = 0 : i64, tpu.core_type = #tpu.core_type<tc>, window_params = [{transform_indices = @transform_0, window_bounds = array<i64: 1, 81, 8>}, {transform_indices = @transform_1, window_bounds = array<i64: 1, 196, 8>}, {pipeline_mode = #tpu.pipeline_mode<synchronous>, transform_indices = @transform_2, window_bounds = array<i64: 196, 81>}, {pipeline_mode = #tpu.pipeline_mode<synchronous>, transform_indices = @transform_3, window_bounds = array<i64: 8, 8>}, {pipeline_mode = #tpu.pipeline_mode<synchronous>, transform_indices = @transform_4, window_bounds = array<i64: 8, 8>}, {pipeline_mode = #tpu.pipeline_mode<synchronous>, transform_indices = @transform_5, window_bounds = array<i64: 1, 8>}, {pipeline_mode = #tpu.pipeline_mode<synchronous>, transform_indices = @transform_6, window_bounds = array<i64: 1, 8>}, {pipeline_mode = #tpu.pipeline_mode<synchronous>, transform_indices = @transform_7, window_bounds = array<i64: 8, 4>}, {pipeline_mode = #tpu.pipeline_mode<synchronous>, transform_indices = @transform_8, window_bounds = array<i64: 4, 8>}, {pipeline_mode = #tpu.pipeline_mode<synchronous>, transform_indices = @transform_9, window_bounds = array<i64: 8, 4>}, {pipeline_mode = #tpu.pipeline_mode<synchronous>, transform_indices = @transform_10, window_bounds = array<i64: 4, 8>}, {transform_indices = @transform_11, window_bounds = array<i64: 1, 196, 8>}]} {
    %c0 = arith.constant 0 : index
    %c0_0 = arith.constant 0 : index
    %c0_1 = arith.constant 0 : index
    %0 = vector.load %arg1[%c0, %c0_0, %c0_1] : memref<1x81x8xbf16, #tpu.memory_space<vmem>>, vector<1x81x8xbf16>
    %1 = vector.shape_cast %0 : vector<1x81x8xbf16> to vector<81x8xbf16>
    %c0_2 = arith.constant 0 : index
    %c0_3 = arith.constant 0 : index
    %c0_4 = arith.constant 0 : index
    %2 = vector.load %arg2[%c0_2, %c0_3, %c0_4] : memref<1x196x8xbf16, #tpu.memory_space<vmem>>, vector<1x196x8xbf16>
    %3 = vector.shape_cast %2 : vector<1x196x8xbf16> to vector<196x8xbf16>
    %c0_5 = arith.constant 0 : index
    %c0_6 = arith.constant 0 : index
    %4 = vector.load %arg3[%c0_5, %c0_6] : memref<196x81xbf16, #tpu.memory_space<vmem>>, vector<196x81xbf16>
    %cst = arith.constant dense<0.000000e+00> : vector<196x8xf32>
    %5 = tpu.matmul %4, %1, %cst {dimension_numbers = #tpu.dot_dimension_numbers<[1], [0], [0], [1], [0, 0, 1, 1], [], []>} : vector<196x81xbf16>, vector<81x8xbf16>, vector<196x8xf32> -> vector<196x8xf32>
    %6 = arith.truncf %5 : vector<196x8xf32> to vector<196x8xbf16>
    %c0_7 = arith.constant 0 : index
    %c0_8 = arith.constant 0 : index
    %7 = vector.load %arg4[%c0_7, %c0_8] : memref<8x8xbf16, #tpu.memory_space<vmem>>, vector<8x8xbf16>
    %cst_9 = arith.constant dense<0.000000e+00> : vector<196x8xf32>
    %8 = tpu.matmul %6, %7, %cst_9 {dimension_numbers = #tpu.dot_dimension_numbers<[1], [0], [0], [1], [0, 0, 1, 1], [], []>} : vector<196x8xbf16>, vector<8x8xbf16>, vector<196x8xf32> -> vector<196x8xf32>
    %c0_10 = arith.constant 0 : index
    %c0_11 = arith.constant 0 : index
    %9 = vector.load %arg5[%c0_10, %c0_11] : memref<8x8xbf16, #tpu.memory_space<vmem>>, vector<8x8xbf16>
    %cst_12 = arith.constant dense<0.000000e+00> : vector<196x8xf32>
    %10 = tpu.matmul %3, %9, %cst_12 {dimension_numbers = #tpu.dot_dimension_numbers<[1], [0], [0], [1], [0, 0, 1, 1], [], []>} : vector<196x8xbf16>, vector<8x8xbf16>, vector<196x8xf32> -> vector<196x8xf32>
    %11 = arith.addf %8, %10 : vector<196x8xf32>
    %c0_13 = arith.constant 0 : index
    %c0_14 = arith.constant 0 : index
    %12 = vector.load %arg6[%c0_13, %c0_14] : memref<1x8xf32, #tpu.memory_space<vmem>>, vector<1x8xf32>
    %13 = vector.broadcast %12 : vector<1x8xf32> to vector<196x8xf32>
    %14 = arith.mulf %11, %13 : vector<196x8xf32>
    %c0_15 = arith.constant 0 : index
    %c0_16 = arith.constant 0 : index
    %15 = vector.load %arg7[%c0_15, %c0_16] : memref<1x8xf32, #tpu.memory_space<vmem>>, vector<1x8xf32>
    %16 = vector.broadcast %15 : vector<1x8xf32> to vector<196x8xf32>
    %17 = arith.addf %14, %16 : vector<196x8xf32>
    %cst_17 = arith.constant 0.000000e+00 : f32
    %18 = vector.broadcast %cst_17 : f32 to vector<196x8xf32>
    %19 = arith.maximumf %17, %18 : vector<196x8xf32>
    %cst_18 = arith.constant dense<0.000000e+00> : vector<8xf32>
    %20 = vector.multi_reduction <add>, %19, %cst_18 [0] : vector<196x8xf32> to vector<8xf32>
    %21 = vector.shape_cast %20 : vector<8xf32> to vector<1x8xf32>
    %cst_19 = arith.constant 1.960000e+02 : f32
    %22 = vector.broadcast %cst_19 : f32 to vector<1x8xf32>
    %23 = arith.divf %21, %22 : vector<1x8xf32>
    %cst_20 = arith.constant dense<0xFF800000> : vector<8xf32>
    %24 = vector.multi_reduction <maximumf>, %19, %cst_20 [0] : vector<196x8xf32> to vector<8xf32>
    %25 = vector.shape_cast %24 : vector<8xf32> to vector<1x8xf32>
    %c0_21 = arith.constant 0 : index
    %c0_22 = arith.constant 0 : index
    %26 = vector.load %arg8[%c0_21, %c0_22] : memref<8x4xf32, #tpu.memory_space<vmem>>, vector<8x4xf32>
    %cst_23 = arith.constant dense<0.000000e+00> : vector<1x4xf32>
    %27 = tpu.matmul %23, %26, %cst_23 {dimension_numbers = #tpu.dot_dimension_numbers<[1], [0], [0], [1], [0, 0, 1, 1], [], []>} : vector<1x8xf32>, vector<8x4xf32>, vector<1x4xf32> -> vector<1x4xf32>
    %cst_24 = arith.constant 0.000000e+00 : f32
    %28 = vector.broadcast %cst_24 : f32 to vector<1x4xf32>
    %29 = arith.maximumf %27, %28 : vector<1x4xf32>
    %c0_25 = arith.constant 0 : index
    %c0_26 = arith.constant 0 : index
    %30 = vector.load %arg9[%c0_25, %c0_26] : memref<4x8xf32, #tpu.memory_space<vmem>>, vector<4x8xf32>
    %cst_27 = arith.constant dense<0.000000e+00> : vector<1x8xf32>
    %31 = tpu.matmul %29, %30, %cst_27 {dimension_numbers = #tpu.dot_dimension_numbers<[1], [0], [0], [1], [0, 0, 1, 1], [], []>} : vector<1x4xf32>, vector<4x8xf32>, vector<1x8xf32> -> vector<1x8xf32>
    %c0_28 = arith.constant 0 : index
    %c0_29 = arith.constant 0 : index
    %32 = vector.load %arg10[%c0_28, %c0_29] : memref<8x4xf32, #tpu.memory_space<vmem>>, vector<8x4xf32>
    %cst_30 = arith.constant dense<0.000000e+00> : vector<1x4xf32>
    %33 = tpu.matmul %25, %32, %cst_30 {dimension_numbers = #tpu.dot_dimension_numbers<[1], [0], [0], [1], [0, 0, 1, 1], [], []>} : vector<1x8xf32>, vector<8x4xf32>, vector<1x4xf32> -> vector<1x4xf32>
    %cst_31 = arith.constant 0.000000e+00 : f32
    %34 = vector.broadcast %cst_31 : f32 to vector<1x4xf32>
    %35 = arith.maximumf %33, %34 : vector<1x4xf32>
    %c0_32 = arith.constant 0 : index
    %c0_33 = arith.constant 0 : index
    %36 = vector.load %arg11[%c0_32, %c0_33] : memref<4x8xf32, #tpu.memory_space<vmem>>, vector<4x8xf32>
    %cst_34 = arith.constant dense<0.000000e+00> : vector<1x8xf32>
    %37 = tpu.matmul %35, %36, %cst_34 {dimension_numbers = #tpu.dot_dimension_numbers<[1], [0], [0], [1], [0, 0, 1, 1], [], []>} : vector<1x4xf32>, vector<4x8xf32>, vector<1x8xf32> -> vector<1x8xf32>
    %38 = arith.addf %31, %37 : vector<1x8xf32>
    %39 = arith.negf %38 : vector<1x8xf32>
    %40 = math.exp %39 : vector<1x8xf32>
    %cst_35 = arith.constant 1.000000e+00 : f32
    %41 = vector.broadcast %cst_35 : f32 to vector<1x8xf32>
    %42 = arith.addf %41, %40 : vector<1x8xf32>
    %43 = arith.divf %41, %42 : vector<1x8xf32>
    %44 = vector.broadcast %43 : vector<1x8xf32> to vector<196x8xf32>
    %45 = arith.mulf %19, %44 : vector<196x8xf32>
    %c0_36 = arith.constant 0 : index
    %c0_37 = arith.constant 0 : index
    %c0_38 = arith.constant 0 : index
    %46 = vector.load %arg12[%c0_36, %c0_37, %c0_38] : memref<1x196x8xf32, #tpu.memory_space<vmem>>, vector<1x196x8xf32>
    %47 = vector.shape_cast %46 : vector<1x196x8xf32> to vector<196x8xf32>
    %48 = vector.shape_cast %45 : vector<196x8xf32> to vector<1x196x8xf32>
    tpu.vector_store %arg12[%c0_36, %c0_37, %c0_38], %48 {strides = array<i32>} : memref<1x196x8xf32, #tpu.memory_space<vmem>>, vector<1x196x8xf32>,
    return
  }
  func.func @transform_0(%arg0: i32) -> (i32, i32, i32) {
    %c0_i32 = arith.constant 0 : i32
    %c0_i32_0 = arith.constant 0 : i32
    %c0_i32_1 = arith.constant 0 : i32
    return %arg0, %c0_i32, %c0_i32_0 : i32, i32, i32
  }
  func.func @transform_1(%arg0: i32) -> (i32, i32, i32) {
    %c0_i32 = arith.constant 0 : i32
    %c0_i32_0 = arith.constant 0 : i32
    %c0_i32_1 = arith.constant 0 : i32
    return %arg0, %c0_i32, %c0_i32_0 : i32, i32, i32
  }
  func.func @transform_2(%arg0: i32) -> (i32, i32) {
    %c0_i32 = arith.constant 0 : i32
    %c0_i32_0 = arith.constant 0 : i32
    %c0_i32_1 = arith.constant 0 : i32
    return %c0_i32, %c0_i32_0 : i32, i32
  }
  func.func @transform_3(%arg0: i32) -> (i32, i32) {
    %c0_i32 = arith.constant 0 : i32
    %c0_i32_0 = arith.constant 0 : i32
    %c0_i32_1 = arith.constant 0 : i32
    return %c0_i32, %c0_i32_0 : i32, i32
  }
  func.func @transform_4(%arg0: i32) -> (i32, i32) {
    %c0_i32 = arith.constant 0 : i32
    %c0_i32_0 = arith.constant 0 : i32
    %c0_i32_1 = arith.constant 0 : i32
    return %c0_i32, %c0_i32_0 : i32, i32
  }
  func.func @transform_5(%arg0: i32) -> (i32, i32) {
    %c0_i32 = arith.constant 0 : i32
    %c0_i32_0 = arith.constant 0 : i32
    %c0_i32_1 = arith.constant 0 : i32
    return %c0_i32, %c0_i32_0 : i32, i32
  }
  func.func @transform_6(%arg0: i32) -> (i32, i32) {
    %c0_i32 = arith.constant 0 : i32
    %c0_i32_0 = arith.constant 0 : i32
    %c0_i32_1 = arith.constant 0 : i32
    return %c0_i32, %c0_i32_0 : i32, i32
  }
  func.func @transform_7(%arg0: i32) -> (i32, i32) {
    %c0_i32 = arith.constant 0 : i32
    %c0_i32_0 = arith.constant 0 : i32
    %c0_i32_1 = arith.constant 0 : i32
    return %c0_i32, %c0_i32_0 : i32, i32
  }
  func.func @transform_8(%arg0: i32) -> (i32, i32) {
    %c0_i32 = arith.constant 0 : i32
    %c0_i32_0 = arith.constant 0 : i32
    %c0_i32_1 = arith.constant 0 : i32
    return %c0_i32, %c0_i32_0 : i32, i32
  }
  func.func @transform_9(%arg0: i32) -> (i32, i32) {
    %c0_i32 = arith.constant 0 : i32
    %c0_i32_0 = arith.constant 0 : i32
    %c0_i32_1 = arith.constant 0 : i32
    return %c0_i32, %c0_i32_0 : i32, i32
  }
  func.func @transform_10(%arg0: i32) -> (i32, i32) {
    %c0_i32 = arith.constant 0 : i32
    %c0_i32_0 = arith.constant 0 : i32
    %c0_i32_1 = arith.constant 0 : i32
    return %c0_i32, %c0_i32_0 : i32, i32
  }
  func.func @transform_11(%arg0: i32) -> (i32, i32, i32) {
    %c0_i32 = arith.constant 0 : i32
    %c0_i32_0 = arith.constant 0 : i32
    %c0_i32_1 = arith.constant 0 : i32
    return %arg0, %c0_i32, %c0_i32_0 : i32, i32, i32
  }
}

</mosaic_0001>

<bundles_post_ra>
// kernel: dual_domain_forward.3
= control target key start
LH: loop header
LB: loop body
LE: loop exit
PB: predicated region body
PF: predicated region fallthrough
CT: control target
= control target key end

     0   :  { %s1661_s9 = smov 0   ;;  %s1983_s0 = inlined_call_operand.vmem [shape: bf16[2,16,128], index: 0, kind: input, shape index: {}]   ;;  %s1984_s1 = inlined_call_operand.vmem [shape: bf16[8,128,72], index: 1, kind: input, shape index: {}]   ;;  %s1985_s2 = inlined_call_operand.vmem [shape: bf16[2,9,72], index: 2, kind: output, shape index: {}]  }
   0x1 LB: > { %s1109_s10 = sadd.s32 4294967295, %s1642_s9   ;;  %p1113_p0 = scmp.ge.s32.totalorder %s1642_s9, 1  ;;  %s1642_s9 = sphi %s1661_s9, %s12_s9  }
   0x2   : > { %p112_p1 = scmp.lt.s32.totalorder %s1642_s9, 3 }
   0x4   : > { %p113_p2 = pnand %p1113_p0, %p112_p1 }
   0x5   : > { %v1571_v0 = vld [vmem:[%s1984_s1 + $0x40] sm:$0xff] (!%p113_p2)   ;;  %v1644_v1 = vmov (!%p113_p2), 0.0   ;;  %v1573_v3 = vld [vmem:[%s1984_s1 + $0x48] sm:$0xff] (!%p113_p2)   ;;  %vm1645_vm0 = vmmov (!%p113_p2), 0   ;;  %p134_p3 = scmp.lt.s32.totalorder (!%p113_p2), %s1109_s10, 1  ;;  %v1575_v5 = vld [vmem:[%s1984_s1 + $0x50] sm:$0xff] (!%p113_p2)  }
   0x6   : > { %116 = sbr.rel (%p113_p2) target bundleno = 355 (0x163), region = 28  ;;  %1375 = vmatprep.subr.bf16.mxu1 (!%p113_p2), %v1644_v1  ;;  %1455 = vmatprep.subr.bf16.mxu0 (!%p113_p2), %v1644_v1  ;;  %v1572_v2 = vld [vmem:[%s1984_s1 + $0x100] sm:$0xff] (!%p113_p2)   ;;  %v1574_v4 = vld [vmem:[%s1984_s1 + $0x108] sm:$0xff] (!%p113_p2)   ;;  %v1576_v6 = vld [vmem:[%s1984_s1 + $0x110] sm:$0xff] (!%p113_p2)   ;;  %vm1048_vm1 = vcmask (!%p113_p2), 581632   ;;  %vm1046_vm3 = vcmask (!%p113_p2), 584704  }
   0x7   : > { %1376 = vmatpush3.bf16.msra.mxu1 (!%p113_p2), %v1571_v0  ;;  %1391 = vmatprep.mubr.msk.bf16.mxu1 (!%p113_p2), %vm1645_vm0, %v1644_v1  ;;  %v1577_v7 = vld [vmem:[%s1984_s1 + $0x58] sm:$0xff] (!%p113_p2)   ;;  %v1579_v9 = vld [vmem:[%s1984_s1 + $0x60] sm:$0xff] (!%p113_p2)   ;;  %v1581_v12 = vld [vmem:[%s1984_s1 + $0x68] sm:$0xff] (!%p113_p2)   ;;  %vm1049_vm2 = vsmask.f32 (!%p113_p2), 256 }
   0x8   : > { %1456 = vmatpush3.bf16.msra.mxu0 (!%p113_p2), %v1572_v2  ;;  %1377 = vmatprep.subr.bf16.mxu1 (!%p113_p2), %v1644_v1  ;;  %v1578_v8 = vld [vmem:[%s1984_s1 + $0x118] sm:$0xff] (!%p113_p2)   ;;  %v1580_v10 = vld [vmem:[%s1984_s1 + $0x120] sm:$0xff] (!%p113_p2)   ;;  %v1582_v13 = vld [vmem:[%s1984_s1 + $0x128] sm:$0xff] (!%p113_p2)  }
   0x9   : > { %1457 = vmatprep.subr.bf16.mxu0 (!%p113_p2), %v1644_v1  ;;  %1471 = vmatprep.mubr.msk.bf16.mxu0 (!%p113_p2), %vm1645_vm0, %v1644_v1  ;;  %v1583_v15 = vld [vmem:[%s1984_s1 + $0x70] sm:$0xff] (!%p113_p2)   ;;  %v1585_v20 = vld [vmem:[%s1984_s1 + $0x78] sm:$0xff] (!%p113_p2)   ;;  %v1588_v27 = vld [vmem:[%s1984_s1] sm:$0xff] (!%p113_p2)  }
   0xa   : > { %v1584_v16 = vld [vmem:[%s1984_s1 + $0x130] sm:$0xff] (!%p113_p2)   ;;  %v1586_v22 = vld [vmem:[%s1984_s1 + $0x138] sm:$0xff] (!%p113_p2)   ;;  %v1589_v30 = vld [vmem:[%s1984_s1 + $0x140] sm:$0xff] (!%p113_p2)  }
   0xb   : > { %1378 = vmatpush3.bf16.msra.mxu1 (!%p113_p2), %v1573_v3  ;;  %v1590_v31 = vld [vmem:[%s1984_s1 + $0x8] sm:$0xff] (!%p113_p2)   ;;  %v1592_v33 = vld [vmem:[%s1984_s1 + $0x10] sm:$0xff] (!%p113_p2)   ;;  %v1594_v35 = vld [vmem:[%s1984_s1 + $0x18] sm:$0xff] (!%p113_p2)  }
   0xc   : > { %1458 = vmatpush3.bf16.msra.mxu0 (!%p113_p2), %v1574_v4  ;;  %1379 = vmatprep.subr.bf16.mxu1 (!%p113_p2), %v1644_v1  ;;  %v1591_v32 = vld [vmem:[%s1984_s1 + $0x148] sm:$0xff] (!%p113_p2)   ;;  %v1593_v34 = vld [vmem:[%s1984_s1 + $0x150] sm:$0xff] (!%p113_p2)   ;;  %v1595_v36 = vld [vmem:[%s1984_s1 + $0x158] sm:$0xff] (!%p113_p2)  }
   0xd   : > { %s1987_s10 = smov (!%p134_p3, %s1109_s10), 1  ;;  %1459 = vmatprep.subr.bf16.mxu0 %v1644_v1  ;;  %v1596_v37 = vld [vmem:[%s1984_s1 + $0x20] sm:$0xff]   ;;  %v1598_v39 = vld [vmem:[%s1984_s1 + $0x28] sm:$0xff]   ;;  %v1600_v41 = vld [vmem:[%s1984_s1 + $0x30] sm:$0xff]  }
   0xe   : > { %s1299_s27 = sshll.u32 %s1987_s10, 3  ;;  %v1597_v38 = vld [vmem:[%s1984_s1 + $0x160] sm:$0xff]   ;;  %v1599_v40 = vld [vmem:[%s1984_s1 + $0x168] sm:$0xff]   ;;  %v1601_v42 = vld [vmem:[%s1984_s1 + $0x170] sm:$0xff]  }
   0xf   : > { %1380 = vmatpush3.bf16.msra.mxu1 %v1575_v5  ;;  %s138_s4 = scalar_lea.vmem %s1983_s0, %s1299_s27  ;;  %v1602_v44 = vld [vmem:[%s1984_s1 + $0x38] sm:$0xff]   ;;  %v1604_v47 = vld [vmem:[%s1984_s1 + $0x80] sm:$0xff]   ;;  %v1606_v50 = vld [vmem:[%s1984_s1 + $0x88] sm:$0xff]   ;;  %s143_s19 = scalar_lea.vmem %s1985_s2, %s1299_s27 }
  0x10   : > { %1460 = vmatpush3.bf16.msra.mxu0 %v1576_v6  ;;  %1381 = vmatprep.subr.bf16.mxu1 %v1644_v1  ;;  %v1721_v11 = vld [vmem:[%s138_s4] sm:$0xff]   ;;  %v1603_v46 = vld [vmem:[%s1984_s1 + $0x178] sm:$0xff]   ;;  %v1607_v51 = vld [vmem:[%s1984_s1 + $0x188] sm:$0xff]  }
  0x11   : > { %1461 = vmatprep.subr.bf16.mxu0 %v1644_v1  ;;  %v1732_v14 = vshll.u32 %v1721_v11, 16  ;;  %v1742_v17 = vshrl.u32 %v1721_v11, 16  ;;  %v611_v28 = vrot.slane %v1721_v11, 2  ;;  %v1605_v49 = vld [vmem:[%s1984_s1 + $0x180] sm:$0xff]   ;;  %v1608_v52 = vld [vmem:[%s1984_s1 + $0x90] sm:$0xff]   ;;  %v1610_v54 = vld [vmem:[%s1984_s1 + $0x98] sm:$0xff]  }
  0x12   : > { %v1609_v53 = vld [vmem:[%s1984_s1 + $0x190] sm:$0xff]   ;;  %v1611_v55 = vld [vmem:[%s1984_s1 + $0x198] sm:$0xff]   ;;  %v1612_v56 = vld [vmem:[%s1984_s1 + $0xa0] sm:$0xff]   ;;  %v389_v0 = vrot.slane %v1721_v11, 1  ;;  %v833_v3 = vrot.slane %v1721_v11, 3 }
  0x13   : > { %1382 = vmatpush3.bf16.msra.mxu1 %v1577_v7  ;;  %v190_v18 = vrot.slane %v1732_v14, 1  ;;  %v499_v19 = vrot.slane %v1742_v17, 1  ;;  %v500_v21 = vrot.slane %v1732_v14, 2  ;;  %v943_v23 = vrot.slane %v1742_v17, 3  ;;  %v1613_v57 = vld [vmem:[%s1984_s1 + $0x1a0] sm:$0xff]   ;;  %v1614_v58 = vld [vmem:[%s1984_s1 + $0xa8] sm:$0xff]   ;;  %vm1050_vm4 = vmand %vm1048_vm1, %vm1049_vm2 }
  0x14   : > { %1462 = vmatpush3.bf16.msra.mxu0 %v1578_v8  ;;  %1383 = vmatprep.subr.bf16.mxu1 %v1644_v1  ;;  %v944_v25 = vrot.slane %v1732_v14, 4  ;;  %v721_v43 = vrot.slane %v1742_v17, 2  ;;  %v722_v45 = vrot.slane %v1732_v14, 3  ;;  %v1615_v59 = vld [vmem:[%s1984_s1 + $0x1a8] sm:$0xff]   ;;  %v1616_v60 = vld [vmem:[%s1984_s1 + $0xb0] sm:$0xff]   ;;  %v1618_v62 = vld [vmem:[%s1984_s1 + $0xb8] sm:$0xff]  }
  0x15   : > { %1463 = vmatprep.subr.bf16.mxu0 %v1644_v1  ;;  %v1757_v24 = vor.u32 %v500_v21, %v499_v19  ;;  %v191_v26 = vor.u32 %v190_v18, %v1742_v17  ;;  %v1617_v61 = vld [vmem:[%s1984_s1 + $0x1b0] sm:$0xff]   ;;  %v1619_v63 = vld [vmem:[%s1984_s1 + $0x1b8] sm:$0xff]   ;;  %v1620_v2 = vld [vmem:[%s1984_s1 + $0xc0] sm:$0xff]  }
  0x16   : > { %v1765_v29 = vor.u32 %v944_v25, %v943_v23  ;;  %v723_v48 = vor.u32 %v722_v45, %v721_v43  ;;  %v1621_v4 = vld [vmem:[%s1984_s1 + $0x1c0] sm:$0xff]   ;;  %v1622_v5 = vld [vmem:[%s1984_s1 + $0xc8] sm:$0xff]   ;;  %v1624_v7 = vld [vmem:[%s1984_s1 + $0xd0] sm:$0xff]  }
  0x17   : > { %1384 = vmatpush3.bf16.msra.mxu1 %v1579_v9  ;;  %v1623_v6 = vld [vmem:[%s1984_s1 + $0x1c8] sm:$0xff]   ;;  %v1625_v8 = vld [vmem:[%s1984_s1 + $0x1d0] sm:$0xff]   ;;  %v1626_v9 = vld [vmem:[%s1984_s1 + $0xd8] sm:$0xff]  }
  0x18   : > { %1464 = vmatpush3.bf16.msra.mxu0 %v1580_v10  ;;  %1385 = vmatprep.subr.bf16.mxu1 %v1644_v1  ;;  %v1627_v10 = vld [vmem:[%s1984_s1 + $0x1d8] sm:$0xff]   ;;  %v1631_v14 = vld [vmem:[%s1984_s1 + $0x1e8] sm:$0xff]  }
  0x19   : > { %1465 = vmatprep.subr.bf16.mxu0 %v1644_v1  ;;  %v1634_v17 = vld [vmem:[%s1984_s1 + $0xf8] sm:$0xff]  }
  0x1a   : > { %v1635_v18 = vld [vmem:[%s1984_s1 + $0x1f8] sm:$0xff]  }
  0x1b   : > { %1386 = vmatpush3.bf16.msra.mxu1 %v1581_v12  ;;  %v1629_v12 = vld [vmem:[%s1984_s1 + $0x1e0] sm:$0xff]  }
  0x1c   : > { %1466 = vmatpush3.bf16.msra.mxu0 %v1582_v13  ;;  %1387 = vmatprep.subr.bf16.mxu1 %v1644_v1  ;;  %v1630_v13 = vld [vmem:[%s1984_s1 + $0xe8] sm:$0xff]  }
  0x1d   : > { %1467 = vmatprep.subr.bf16.mxu0 %v1644_v1 }
  0x1f   : > { %1388 = vmatpush3.bf16.msra.mxu1 %v1583_v15  ;;  %v1632_v15 = vld [vmem:[%s1984_s1 + $0xf0] sm:$0xff]  }
  0x20   : > { %1468 = vmatpush3.bf16.msra.mxu0 %v1584_v16  ;;  %1389 = vmatprep.subr.bf16.mxu1 %v1644_v1  ;;  %v1633_v16 = vld [vmem:[%s1984_s1 + $0x1f0] sm:$0xff]  }
  0x21   : > { %1469 = vmatprep.subr.bf16.mxu0 %v1644_v1 }
  0x23   : > { %1390 = vmatpush3.bf16.msra.mxu1 %v1585_v20 }
  0x24   : > { %1470 = vmatpush3.bf16.msra.mxu0 %v1586_v22  ;;  %1395 = vmatprep.subr.bf16.mxu1 %v1644_v1 }
  0x25   : > { %1475 = vmatprep.subr.bf16.mxu0 %v1644_v1 }
  0x26   : > { %1392 = vmatmul.mubr.bf16.vlgmr.msra.gmra.mrb[0].mxu1 %v191_v26 }
  0x27   : > { %1396 = vmatpush3.bf16.msra.mxu1 %v1588_v27  ;;  %1472 = vmatmul.mubr.bf16.vlgmr.msra.gmra.mrb[0].mxu0 %v611_v28 }
  0x28   : > { %1476 = vmatpush3.bf16.msra.mxu0 %v1589_v30  ;;  %1397 = vmatprep.subr.bf16.mxu1 %v1644_v1 }
  0x29   : > { %1477 = vmatprep.subr.bf16.mxu0 %v1644_v1  ;;  %1411 = vmatprep.mubr.msk.bf16.mxu1 %vm1645_vm0, %v1644_v1 }
  0x2a   : > { %1491 = vmatprep.mubr.msk.bf16.mxu0 %vm1645_vm0, %v1644_v1 }
  0x2b   : > { %1398 = vmatpush3.bf16.msra.mxu1 %v1590_v31 }
  0x2c   : > { %1478 = vmatpush3.bf16.msra.mxu0 %v1591_v32  ;;  %1399 = vmatprep.subr.bf16.mxu1 %v1644_v1 }
  0x2d   : > { %1479 = vmatprep.subr.bf16.mxu0 %v1644_v1 }
  0x2f   : > { %1400 = vmatpush3.bf16.msra.mxu1 %v1592_v33 }
  0x30   : > { %1480 = vmatpush3.bf16.msra.mxu0 %v1593_v34  ;;  %1401 = vmatprep.subr.bf16.mxu1 %v1644_v1 }
  0x31   : > { %1481 = vmatprep.subr.bf16.mxu0 %v1644_v1 }
  0x33   : > { %1402 = vmatpush3.bf16.msra.mxu1 %v1594_v35 }
  0x34   : > { %1482 = vmatpush3.bf16.msra.mxu0 %v1595_v36  ;;  %1403 = vmatprep.subr.bf16.mxu1 %v1644_v1 }
  0x35   : > { %1483 = vmatprep.subr.bf16.mxu0 %v1644_v1 }
  0x37   : > { %1404 = vmatpush3.bf16.msra.mxu1 %v1596_v37 }
  0x38   : > { %1484 = vmatpush3.bf16.msra.mxu0 %v1597_v38  ;;  %1405 = vmatprep.subr.bf16.mxu1 %v1644_v1 }
  0x39   : > { %1485 = vmatprep.subr.bf16.mxu0 %v1644_v1 }
  0x3b   : > { %1406 = vmatpush3.bf16.msra.mxu1 %v1598_v39 }
  0x3c   : > { %1486 = vmatpush3.bf16.msra.mxu0 %v1599_v40  ;;  %1407 = vmatprep.subr.bf16.mxu1 %v1644_v1 }
  0x3d   : > { %1487 = vmatprep.subr.bf16.mxu0 %v1644_v1 }
  0x3f   : > { %1408 = vmatpush3.bf16.msra.mxu1 %v1600_v41 }
  0x40   : > { %1488 = vmatpush3.bf16.msra.mxu0 %v1601_v42  ;;  %1409 = vmatprep.subr.bf16.mxu1 %v1644_v1 }
  0x41   : > { %1489 = vmatprep.subr.bf16.mxu0 %v1644_v1 }
  0x43   : > { %1410 = vmatpush3.bf16.msra.mxu1 %v1602_v44 }
  0x44   : > { %1490 = vmatpush3.bf16.msra.mxu0 %v1603_v46  ;;  %1415 = vmatprep.subr.bf16.mxu1 %v1644_v1 }
  0x45   : > { %1495 = vmatprep.subr.bf16.mxu0 %v1644_v1 }
  0x46   : > { %1412 = vmatmul.mubr.bf16.vlgmr.msra.gmra.mrb[0].mxu1 %v1721_v11  ;;  %v1628_v11 = vld [vmem:[%s1984_s1 + $0xe0] sm:$0xff]  }
  0x47   : > { %1416 = vmatpush3.bf16.msra.mxu1 %v1604_v47  ;;  %1492 = vmatmul.mubr.bf16.vlgmr.msra.gmra.mrb[0].mxu0 %v723_v48 }
  0x48   : > { %1496 = vmatpush3.bf16.msra.mxu0 %v1605_v49  ;;  %1417 = vmatprep.subr.bf16.mxu1 %v1644_v1 }
  0x49   : > { %1497 = vmatprep.subr.bf16.mxu0 %v1644_v1  ;;  %1431 = vmatprep.mubr.msk.bf16.mxu1 %vm1645_vm0, %v1644_v1 }
  0x4a   : > { %1511 = vmatprep.mubr.msk.bf16.mxu0 %vm1645_vm0, %v1644_v1 }
  0x4b   : > { %1418 = vmatpush3.bf16.msra.mxu1 %v1606_v50 }
  0x4c   : > { %1498 = vmatpush3.bf16.msra.mxu0 %v1607_v51  ;;  %1419 = vmatprep.subr.bf16.mxu1 %v1644_v1 }
  0x4d   : > { %1499 = vmatprep.subr.bf16.mxu0 %v1644_v1 }
  0x4f   : > { %1420 = vmatpush3.bf16.msra.mxu1 %v1608_v52 }
  0x50   : > { %1500 = vmatpush3.bf16.msra.mxu0 %v1609_v53  ;;  %1421 = vmatprep.subr.bf16.mxu1 %v1644_v1 }
  0x51   : > { %1501 = vmatprep.subr.bf16.mxu0 %v1644_v1 }
  0x53   : > { %1422 = vmatpush3.bf16.msra.mxu1 %v1610_v54 }
  0x54   : > { %1502 = vmatpush3.bf16.msra.mxu0 %v1611_v55  ;;  %1423 = vmatprep.subr.bf16.mxu1 %v1644_v1 }
  0x55   : > { %1503 = vmatprep.subr.bf16.mxu0 %v1644_v1 }
  0x57   : > { %1424 = vmatpush3.bf16.msra.mxu1 %v1612_v56 }
  0x58   : > { %1504 = vmatpush3.bf16.msra.mxu0 %v1613_v57  ;;  %1425 = vmatprep.subr.bf16.mxu1 %v1644_v1 }
  0x59   : > { %1505 = vmatprep.subr.bf16.mxu0 %v1644_v1 }
  0x5b   : > { %1426 = vmatpush3.bf16.msra.mxu1 %v1614_v58 }
  0x5c   : > { %1506 = vmatpush3.bf16.msra.mxu0 %v1615_v59  ;;  %1427 = vmatprep.subr.bf16.mxu1 %v1644_v1 }
  0x5d   : > { %1507 = vmatprep.subr.bf16.mxu0 %v1644_v1 }
  0x5f   : > { %1428 = vmatpush3.bf16.msra.mxu1 %v1616_v60 }
  0x60   : > { %1508 = vmatpush3.bf16.msra.mxu0 %v1617_v61  ;;  %1429 = vmatprep.subr.bf16.mxu1 %v1644_v1 }
  0x61   : > { %1509 = vmatprep.subr.bf16.mxu0 %v1644_v1 }
  0x63   : > { %1430 = vmatpush3.bf16.msra.mxu1 %v1618_v62 }
  0x64   : > { %1510 = vmatpush3.bf16.msra.mxu0 %v1619_v63  ;;  %1435 = vmatprep.subr.bf16.mxu1 %v1644_v1 }
  0x65   : > { %1515 = vmatprep.subr.bf16.mxu0 %v1644_v1 }
  0x66   : > { %1432 = vmatmul.mubr.bf16.vlgmr.msra.gmra.mrb[0].mxu1 %v389_v0 }
  0x67   : > { %1436 = vmatpush3.bf16.msra.mxu1 %v1620_v2  ;;  %1512 = vmatmul.mubr.bf16.vlgmr.msra.gmra.mrb[0].mxu0 %v833_v3 }
  0x68   : > { %1516 = vmatpush3.bf16.msra.mxu0 %v1621_v4  ;;  %1437 = vmatprep.subr.bf16.mxu1 %v1644_v1 }
  0x69   : > { %1517 = vmatprep.subr.bf16.mxu0 %v1644_v1  ;;  %1451 = vmatprep.mubr.msk.bf16.mxu1 %vm1645_vm0, %v1644_v1 }
  0x6a   : > { %1531 = vmatprep.mubr.msk.bf16.mxu0 %vm1645_vm0, %v1644_v1 }
  0x6b   : > { %1438 = vmatpush3.bf16.msra.mxu1 %v1622_v5 }
  0x6c   : > { %1518 = vmatpush3.bf16.msra.mxu0 %v1623_v6  ;;  %1439 = vmatprep.subr.bf16.mxu1 %v1644_v1 }
  0x6d   : > { %1519 = vmatprep.subr.bf16.mxu0 %v1644_v1 }
  0x6f   : > { %1440 = vmatpush3.bf16.msra.mxu1 %v1624_v7 }
  0x70   : > { %1520 = vmatpush3.bf16.msra.mxu0 %v1625_v8  ;;  %1441 = vmatprep.subr.bf16.mxu1 %v1644_v1 }
  0x71   : > { %1521 = vmatprep.subr.bf16.mxu0 %v1644_v1 }
  0x73   : > { %1442 = vmatpush3.bf16.msra.mxu1 %v1626_v9 }
  0x74   : > { %1522 = vmatpush3.bf16.msra.mxu0 %v1627_v10  ;;  %1443 = vmatprep.subr.bf16.mxu1 %v1644_v1 }
  0x75   : > { %1523 = vmatprep.subr.bf16.mxu0 %v1644_v1 }
  0x77   : > { %1444 = vmatpush3.bf16.msra.mxu1 %v1628_v11 }
  0x78   : > { %1524 = vmatpush3.bf16.msra.mxu0 %v1629_v12  ;;  %1445 = vmatprep.subr.bf16.mxu1 %v1644_v1 }
  0x79   : > { %1525 = vmatprep.subr.bf16.mxu0 %v1644_v1 }
  0x7b   : > { %1446 = vmatpush3.bf16.msra.mxu1 %v1630_v13 }
  0x7c   : > { %1526 = vmatpush3.bf16.msra.mxu0 %v1631_v14  ;;  %1447 = vmatprep.subr.bf16.mxu1 %v1644_v1 }
  0x7d   : > { %1527 = vmatprep.subr.bf16.mxu0 %v1644_v1 }
  0x7f   : > { %1448 = vmatpush3.bf16.msra.mxu1 %v1632_v15 }
  0x80   : > { %1528 = vmatpush3.bf16.msra.mxu0 %v1633_v16  ;;  %1449 = vmatprep.subr.bf16.mxu1 %v1644_v1 }
  0x81   : > { %1529 = vmatprep.subr.bf16.mxu0 %v1644_v1 }
  0x83   : > { %1450 = vmatpush3.bf16.msra.mxu1 %v1634_v17 }
  0x84   : > { %1530 = vmatpush3.bf16.msra.mxu0 %v1635_v18 }
  0x86   : > { %1452 = vmatmul.mubr.bf16.vlgmr.msra.gmra.mrb[0].mxu1 %v1757_v24 }
  0x87   : > { %1532 = vmatmul.mubr.bf16.vlgmr.msra.gmra.mrb[0].mxu0 %v1765_v29  ;;  %v1051_v29 = vld [vmem:[%s143_s19 + $0x4] sm:$0x1] }
 0x159   : > { %v585_v19 = vpop.f32.mrb[0].mxu1 }
 0x15a   : > { %v1029_v20 = vpop.f32.mrb[0].mxu0  ;;  %v1453_v21 = vpop.f32.mrb[1].mxu1 }
 0x15b   : > { %v1535_v22 = vadd.f32 %v1029_v20, %v585_v19  ;;  %v1533_v23 = vpop.f32.mrb[1].mxu0  ;;  %v588_v25 = vpop.f32.mrb[2].mxu1 }
 0x15c   : > { %v1032_v1 = vpop.f32.mrb[2].mxu0  ;;  %v1454_v26 = vpop.f32.mrb[3].mxu1 }
 0x15d   : > { %v1301_v27 = vpack.c.bf16 %v1535_v22, %v1535_v22  ;;  %v1536_v24 = vadd.f32 %v1032_v1, %v588_v25  ;;  %v1534_v28 = vpop.f32.mrb[3].mxu0 }
 0x15f   : > { %1047 = vst.msk [vmem:[%s143_s19] sm:$0xf] %vm1046_vm3, %v1301_v27  ;;  %v1302_v30 = vpack.c.bf16 %v1536_v24, %v1536_v24 }
 0x161   : > { %v1052_v31 = vsel %vm1050_vm4, %v1302_v30, %v1051_v29 }
 0x162   : > { %1053 = vst [vmem:[%s143_s19 + $0x4] sm:$0x1] %v1052_v31 }
 0x163 PF: > { %s12_s9 = sadd.s32 1, %s1642_s9  }
 0x164   : > { %p9_p4 = scmp.ge.s32.totalorder %s12_s9, 4  }
 0x166   :  { %11 = sbr.rel (!%p9_p4) target bundleno = 1 (0x1), region = 65 }

// kernel: dual_domain_forward.4
= control target key start
LH: loop header
LB: loop body
LE: loop exit
PB: predicated region body
PF: predicated region fallthrough
CT: control target
= control target key end

     0   :  { %s613_s9 = smov 0   ;;  %s679_s0 = inlined_call_operand.vmem [shape: bf16[2,16,64], index: 0, kind: input, shape index: {}]   ;;  %s680_s1 = inlined_call_operand.vmem [shape: bf16[3,64,112], index: 1, kind: input, shape index: {}]   ;;  %s681_s2 = inlined_call_operand.vmem [shape: bf16[2,14,112], index: 2, kind: output, shape index: {}]  }
   0x1 LB: > { %s459_s10 = sadd.s32 4294967295, %s594_s9   ;;  %p463_p0 = scmp.ge.s32.totalorder %s594_s9, 1  ;;  %s594_s9 = sphi %s613_s9, %s12_s9  }
   0x2   : > { %p112_p1 = scmp.lt.s32.totalorder %s594_s9, 3 }
   0x4   : > { %p113_p2 = pnand %p463_p0, %p112_p1 }
   0x5   : > { %v575_v0 = vld [vmem:[%s680_s1] sm:$0xff] (!%p113_p2)   ;;  %v596_v1 = vmov (!%p113_p2), 0.0   ;;  %v576_v2 = vld [vmem:[%s680_s1 + $0x8] sm:$0xff] (!%p113_p2)   ;;  %vm597_vm0 = vmmov (!%p113_p2), 0   ;;  %p134_p3 = scmp.lt.s32.totalorder (!%p113_p2), %s459_s10, 1  ;;  %v577_v4 = vld [vmem:[%s680_s1 + $0x10] sm:$0xff] (!%p113_p2)  }
   0x6   : > { %116 = sbr.rel (%p113_p2) target bundleno = 257 (0x101), region = 28  ;;  %535 = vmatprep.subr.bf16.mxu0 (!%p113_p2), %v596_v1  ;;  %523 = vmatprep.subr.bf16.mxu1 (!%p113_p2), %v596_v1  ;;  %v579_v3 = vld [vmem:[%s680_s1 + $0x20] sm:$0xff] (!%p113_p2)   ;;  %v582_v5 = vld [vmem:[%s680_s1 + $0x28] sm:$0xff] (!%p113_p2)   ;;  %v578_v6 = vld [vmem:[%s680_s1 + $0x18] sm:$0xff] (!%p113_p2)   ;;  %vm200_vm1 = vcmask (!%p113_p2), 523264   ;;  %vm400_vm2 = vcmask (!%p113_p2), 912384  }
   0x7   : > { %536 = vmatpush3.bf16.msra.mxu0 (!%p113_p2), %v575_v0  ;;  %543 = vmatprep.mubr.msk.bf16.mxu0 (!%p113_p2), %vm597_vm0, %v596_v1  ;;  %v584_v8 = vld [vmem:[%s680_s1 + $0x30] sm:$0xff] (!%p113_p2)   ;;  %v581_v12 = vld [vmem:[%s680_s1 + $0x40] sm:$0xff] (!%p113_p2)   ;;  %v586_v13 = vld [vmem:[%s680_s1 + $0x38] sm:$0xff] (!%p113_p2)   ;;  %vm402_vm3 = vcmask (!%p113_p2), 911360  }
   0x8   : > { %537 = vmatprep.subr.bf16.mxu0 (!%p113_p2), %v596_v1  ;;  %531 = vmatprep.mubr.msk.bf16.mxu1 (!%p113_p2), %vm597_vm0, %v596_v1  ;;  %v583_v15 = vld [vmem:[%s680_s1 + $0x48] sm:$0xff] (!%p113_p2)   ;;  %v585_v16 = vld [vmem:[%s680_s1 + $0x50] sm:$0xff] (!%p113_p2)   ;;  %v587_v17 = vld [vmem:[%s680_s1 + $0x58] sm:$0xff] (!%p113_p2)  }
   0x9   : > { %524 = vmatpush3.bf16.msra.mxu1 (!%p113_p2), %v579_v3 }
   0xa   : > { %525 = vmatprep.subr.bf16.mxu1 (!%p113_p2), %v596_v1 }
   0xb   : > { %538 = vmatpush3.bf16.msra.mxu0 (!%p113_p2), %v576_v2 }
   0xc   : > { %539 = vmatprep.subr.bf16.mxu0 (!%p113_p2), %v596_v1 }
   0xd   : > { %s683_s10 = smov (!%p134_p3, %s459_s10), 1  ;;  %526 = vmatpush3.bf16.msra.mxu1 %v582_v5 }
   0xe   : > { %s504_s19 = sshll.u32 %s683_s10, 3  ;;  %527 = vmatprep.subr.bf16.mxu1 %v596_v1 }
   0xf   : > { %s138_s24 = scalar_lea.vmem %s679_s0, %s504_s19  ;;  %540 = vmatpush3.bf16.msra.mxu0 %v577_v4  ;;  %s143_s15 = scalar_lea.vmem %s681_s2, %s504_s19 }
  0x10   : > { %v580_v7 = vld [vmem:[%s138_s24] sm:$0xff]   ;;  %541 = vmatprep.subr.bf16.mxu0 %v596_v1 }
  0x11   : > { %v172_v9 = vshll.u32 %v580_v7, 16  ;;  %v170_v10 = vshrl.u32 %v580_v7, 16  ;;  %528 = vmatpush3.bf16.msra.mxu1 %v584_v8  ;;  %v321_v18 = vrot.slane %v580_v7, 1 }
  0x12   : > { %529 = vmatprep.subr.bf16.mxu1 %v596_v1 }
  0x13   : > { %v174_v11 = vrot.slane %v172_v9, 1  ;;  %542 = vmatpush3.bf16.msra.mxu0 %v578_v6 }
  0x14   : > { %547 = vmatprep.subr.bf16.mxu0 %v596_v1 }
  0x15   : > { %v175_v14 = vor.u32 %v174_v11, %v170_v10  ;;  %530 = vmatpush3.bf16.msra.mxu1 %v586_v13 }
  0x16   : > { %544 = vmatmul.mubr.msk.bf16.vlgmr.msra.gmra.mrb[0].mxu0 %vm200_vm1, %v580_v7 }
  0x17   : > { %548 = vmatpush3.bf16.msra.mxu0 %v581_v12  ;;  %555 = vmatprep.mubr.msk.bf16.mxu0 %vm597_vm0, %v596_v1 }
  0x18   : > { %549 = vmatprep.subr.bf16.mxu0 %v596_v1  ;;  %532 = vmatmul.mubr.msk.bf16.vlgmr.msra.gmra.mrb[0].mxu1 %vm200_vm1, %v175_v14 }
  0x1b   : > { %550 = vmatpush3.bf16.msra.mxu0 %v583_v15 }
  0x1c   : > { %551 = vmatprep.subr.bf16.mxu0 %v596_v1 }
  0x1f   : > { %552 = vmatpush3.bf16.msra.mxu0 %v585_v16 }
  0x20   : > { %553 = vmatprep.subr.bf16.mxu0 %v596_v1 }
  0x23   : > { %554 = vmatpush3.bf16.msra.mxu0 %v587_v17 }
  0x26   : > { %556 = vmatmul.mubr.msk.bf16.vlgmr.msra.gmra.mrb[0].mxu0 %vm200_vm1, %v321_v18 }
  0xeb   : > { %v238_v19 = vpop.f32.mrb[0].mxu1 }
  0xec   : > { %v533_v20 = vpop.f32.mrb[1].mxu1 }
  0xed   : > { %v241_v21 = vpop.f32.mrb[2].mxu1 }
  0xee   : > { %v534_v22 = vpop.f32.mrb[3].mxu1 }
  0xf9   : > { %v383_v23 = vpop.f32.mrb[0].mxu0 }
  0xfa   : > { %v559_v24 = vadd.f32 %v383_v23, %v238_v19  ;;  %v557_v25 = vpop.f32.mrb[1].mxu0 }
  0xfb   : > { %v386_v26 = vpop.f32.mrb[2].mxu0 }
  0xfc   : > { %v506_v27 = vpack.c.bf16 %v559_v24, %v559_v24  ;;  %v560_v28 = vadd.f32 %v386_v26, %v241_v21  ;;  %v558_v29 = vpop.f32.mrb[3].mxu0 }
  0xfe   : > { %401 = vst.msk [vmem:[%s143_s15] sm:$0xf] %vm400_vm2, %v506_v27  ;;  %v507_v30 = vpack.c.bf16 %v560_v28, %v560_v28 }
 0x100   : > { %403 = vst.msk [vmem:[%s143_s15 + $0x4] sm:$0x7] %vm402_vm3, %v507_v30 }
 0x101 PF: > { %s12_s9 = sadd.s32 1, %s594_s9  }
 0x102   : > { %p9_p4 = scmp.ge.s32.totalorder %s12_s9, 4  }
 0x104   :  { %11 = sbr.rel (!%p9_p4) target bundleno = 1 (0x1), region = 60 }

// kernel: dual_domain_forward.5
= control target key start
LH: loop header
LB: loop body
LE: loop exit
PB: predicated region body
PF: predicated region fallthrough
CT: control target
= control target key end

     0   :  { %s2323_s17 = smov 0   ;;  %s2852_s0 = inlined_call_operand.vmem [shape: bf16[2,81,8], index: 0, kind: input, shape index: {}]   ;;  %s2853_s1 = inlined_call_operand.vmem [shape: bf16[2,196,8], index: 1, kind: input, shape index: {}]   ;;  %s2854_s2 = inlined_call_operand.vmem [shape: bf16[196,81], index: 2, kind: input, shape index: {}]   ;;  %s2855_s3 = inlined_call_operand.vmem [shape: bf16[8,8], index: 3, kind: input, shape index: {}]   ;;  %s2856_s4 = inlined_call_operand.vmem [shape: bf16[8,8], index: 4, kind: input, shape index: {}]   ;;  %s2857_s5 = inlined_call_operand.vmem [shape: f32[1,8], index: 5, kind: input, shape index: {}]   ;;  %s2858_s6 = inlined_call_operand.vmem [shape: f32[1,8], index: 6, kind: input, shape index: {}]   ;;  %s2859_s7 = inlined_call_operand.vmem [shape: f32[8,4], index: 7, kind: input, shape index: {}]   ;;  %s2860_s8 = inlined_call_operand.vmem [shape: f32[4,8], index: 8, kind: input, shape index: {}]   ;;  %s2861_s9 = inlined_call_operand.vmem [shape: f32[8,4], index: 9, kind: input, shape index: {}]   ;;  %s2862_s10 = inlined_call_operand.vmem [shape: f32[4,8], index: 10, kind: input, shape index: {}]   ;;  %s2863_s11 = inlined_call_operand.vmem [shape: f32[2,196,8], index: 11, kind: output, shape index: {}]  }
   0x1 LB: > { %s1817_s18 = sadd.s32 4294967295, %s2258_s17   ;;  %p1821_p0 = scmp.ge.s32.totalorder %s2258_s17, 1  ;;  %s2258_s17 = sphi %s2323_s17, %s21_s17  }
   0x2   : > { %p347_p1 = scmp.lt.s32.totalorder %s2258_s17, 3 }
   0x4   : > { %p348_p2 = pnand %p1821_p0, %p347_p1 }
   0x5   : > { %p392_p3 = scmp.lt.s32.totalorder (!%p348_p2), %s1817_s18, 1  ;;  %v2260_v0 = vmov (!%p348_p2), 0.0   ;;  %vm2261_vm0 = vmmov (!%p348_p2), 0   ;;  %vm605_vm1 = vcmask (!%p348_p2), 1040384   ;;  %vm865_vm2 = vcmask (!%p348_p2), 1043456   ;;  %v2222_v15 = vld [vmem:[%s2854_s2] sm:$0xff] (!%p348_p2)  }
   0x6   : > { %351 = sbr.rel (%p348_p2) target bundleno = 1070 (0x42e), region = 64  ;;  %1962 = vmatprep.subr.bf16.mxu0 (!%p348_p2), %v2260_v0  ;;  %1974 = vmatprep.mubr.msk.bf16.mxu0 (!%p348_p2), %vm2261_vm0, %v2260_v0  ;;  %vm825_vm3 = vcmask (!%p348_p2), 64512   ;;  %v761_v7 = vld [vmem:[%s2856_s4] sm:$0xf] (!%p348_p2)  ;;  %v2262_v11 = vmov (!%p348_p2), 0   ;;  %vm565_vm4 = vcmask (!%p348_p2), 662528  }
   0x7   : > { %2154 = vmatprep.subr.bf16.mxu1 (!%p348_p2), %v2260_v0  ;;  %2044 = vmatprep.mubr.msk.bf16.mxu1 (!%p348_p2), %vm2261_vm0, %v2260_v0  ;;  %v867_v8 = vsel (!%p348_p2), %vm865_vm2, %v761_v7, 0  ;;  %v760_v10 = vld [vmem:[%s2855_s3] sm:$0xf] (!%p348_p2)  ;;  %v607_v12 = vsel (!%p348_p2), %vm605_vm1, 65535, %v2262_v11  ;;  %v2223_v17 = vld [vmem:[%s2854_s2 + $0x8] sm:$0xff] (!%p348_p2)   ;;  %v2224_v19 = vld [vmem:[%s2854_s2 + $0x10] sm:$0xff] (!%p348_p2)  }
   0x8   : > { %2155 = vmatpush3.bf16.msra.mxu1 (!%p348_p2), %v867_v8  ;;  %v1045_v13 = vsel (!%p348_p2), %vm865_vm2, %v760_v10, 0  ;;  %v2225_v21 = vld [vmem:[%s2854_s2 + $0x18] sm:$0xff] (!%p348_p2)   ;;  %v2226_v23 = vld [vmem:[%s2854_s2 + $0x20] sm:$0xff] (!%p348_p2)   ;;  %v2227_v25 = vld [vmem:[%s2854_s2 + $0x28] sm:$0xff] (!%p348_p2)   ;;  %vm1319_vm5 = vcmask (!%p348_p2), 60416   ;;  %vm1537_vm6 = vcmask (!%p348_p2), 31744  }
   0x9   : > { %2080 = vmatprep.subr.bf16.mxu1 (!%p348_p2), %v2260_v0  ;;  %v2228_v27 = vld [vmem:[%s2854_s2 + $0x30] sm:$0xff] (!%p348_p2)   ;;  %v2229_v29 = vld [vmem:[%s2854_s2 + $0x38] sm:$0xff] (!%p348_p2)   ;;  %v2230_v31 = vld [vmem:[%s2854_s2 + $0x40] sm:$0xff] (!%p348_p2)  }
   0xa   : > { %v2231_v32 = vld [vmem:[%s2854_s2 + $0x48] sm:$0xff] (!%p348_p2)   ;;  %v2232_v33 = vld [vmem:[%s2854_s2 + $0x50] sm:$0xff] (!%p348_p2)   ;;  %v2233_v34 = vld [vmem:[%s2854_s2 + $0x58] sm:$0xff] (!%p348_p2)  }
   0xb   : > { %v2234_v35 = vld [vmem:[%s2854_s2 + $0x60] ss:$0 sps:$4 sm:$0x33] (!%p348_p2)  }
   0xd   : > { %s2865_s18 = smov (!%p392_p3, %s1817_s18), 1 }
   0xe   : > { %s2202_s19 = smul.u32 44, %s2865_s18 }
   0xf   : > { %s2203_s23 = smul.u32 100, %s2865_s18 }
  0x10   : > { %s396_s22 = scalar_lea.vmem %s2852_s0, %s2202_s19  ;;  %s2204_s19 = smul.u32 200, %s2865_s18 }
  0x11   : > { %v2216_v1 = vld [vmem:[%s396_s22] sm:$0xff]   ;;  %v2217_v2 = vld [vmem:[%s396_s22 + $0x8] sm:$0xff]   ;;  %v2218_v3 = vld [vmem:[%s396_s22 + $0x10] sm:$0xff]   ;;  %s2349_s26 = scalar_lea.vmem %s2853_s1, %s2203_s23 }
  0x12   : > { %1963 = vmatpush3.bf16.msra.mxu0 %v2216_v1  ;;  %v2219_v4 = vld [vmem:[%s396_s22 + $0x18] sm:$0xff]   ;;  %v2220_v5 = vld [vmem:[%s396_s22 + $0x20] sm:$0xff]   ;;  %v2221_v6 = vld [vmem:[%s396_s22 + $0x28] ss:$0 sps:$4 sm:$0x11]   ;;  %s2772_s22 = scalar_lea.vmem %s2863_s11, %s2204_s19 }
  0x13   : > { %1964 = vmatprep.subr.bf16.mxu0 %v2260_v0  ;;  %v2235_v9 = vld [vmem:[%s2349_s26 + $0x20] sm:$0xff]   ;;  %v609_v14 = vand.u32 %v2221_v6, %v607_v12  ;;  %v2236_v16 = vld [vmem:[%s2349_s26 + $0x28] sm:$0xff]   ;;  %v2237_v18 = vld [vmem:[%s2349_s26 + $0x30] sm:$0xff]  }
  0x14   : > { %2045 = vmatmul.mubr.msk.bf16.vlgmr.msra.gmra.mrb[0].mxu1 %vm825_vm3, %v2235_v9  ;;  %v2238_v20 = vld [vmem:[%s2349_s26 + $0x38] sm:$0xff]   ;;  %v2239_v22 = vld [vmem:[%s2349_s26 + $0x40] sm:$0xff]   ;;  %v2240_v24 = vld [vmem:[%s2349_s26 + $0x48] sm:$0xff]  }
  0x15   : > { %2081 = vmatpush3.bf16.msra.mxu1 %v1045_v13  ;;  %2048 = vmatprep.mubr.msk.bf16.mxu1 %vm2261_vm0, %v2260_v0  ;;  %v2241_v26 = vld [vmem:[%s2349_s26 + $0x50] sm:$0xff]   ;;  %v2242_v28 = vld [vmem:[%s2349_s26 + $0x58] sm:$0xff]   ;;  %v2243_v30 = vld [vmem:[%s2349_s26 + $0x60] ss:$0 sps:$4 sm:$0x33]  }
  0x16   : > { %1965 = vmatpush3.bf16.msra.mxu0 %v2217_v2  ;;  %v2244_v36 = vld [vmem:[%s2349_s26] sm:$0xff]   ;;  %v2245_v37 = vld [vmem:[%s2349_s26 + $0x8] sm:$0xff]   ;;  %v2246_v38 = vld [vmem:[%s2349_s26 + $0x10] sm:$0xff]  }
  0x17   : > { %1966 = vmatprep.subr.bf16.mxu0 %v2260_v0  ;;  %v2247_v39 = vld [vmem:[%s2349_s26 + $0x18] sm:$0xff]  }
  0x1a   : > { %1967 = vmatpush3.bf16.msra.mxu0 %v2218_v3 }
  0x1b   : > { %1968 = vmatprep.subr.bf16.mxu0 %v2260_v0 }
  0x1c   : > { %2049 = vmatmul.mubr.msk.bf16.gmra.mrb[4].mxu1 %vm825_vm3, %v2236_v16 }
  0x1d   : > { %2052 = vmatprep.mubr.msk.bf16.mxu1 %vm2261_vm0, %v2260_v0 }
  0x1e   : > { %1969 = vmatpush3.bf16.msra.mxu0 %v2219_v4 }
  0x1f   : > { %1970 = vmatprep.subr.bf16.mxu0 %v2260_v0 }
  0x22   : > { %1971 = vmatpush3.bf16.msra.mxu0 %v2220_v5 }
  0x23   : > { %1972 = vmatprep.subr.bf16.mxu0 %v2260_v0 }
  0x24   : > { %2053 = vmatmul.mubr.msk.bf16.gmra.mrb[8].mxu1 %vm825_vm3, %v2237_v18 }
  0x25   : > { %2056 = vmatprep.mubr.msk.bf16.mxu1 %vm2261_vm0, %v2260_v0 }
  0x26   : > { %1973 = vmatpush3.bf16.msra.mxu0 %v609_v14 }
  0x27   : > { %2026 = vmatprep.subr.bf16.mxu0 %v2260_v0 }
  0x29   : > { %1975 = vmatmul.mubr.msk.bf16.vlgmr.msra.gmra.mrb[0].mxu0 %vm565_vm4, %v2222_v15 }
  0x2a   : > { %1978 = vmatprep.mubr.msk.bf16.mxu0 %vm2261_vm0, %v2260_v0  ;;  %2027 = vmatpush3.bf16.msra.mxu0 %v867_v8 }
  0x2b   : > { %2134 = vmatprep.subr.mxu0 %v2260_v0 }
  0x2c   : > { %2057 = vmatmul.mubr.msk.bf16.gmra.mrb[12].mxu1 %vm825_vm3, %v2238_v20 }
  0x2d   : > { %2060 = vmatprep.mubr.msk.bf16.mxu1 %vm2261_vm0, %v2260_v0 }
  0x31   : > { %1979 = vmatmul.mubr.msk.bf16.gmra.mrb[4].mxu0 %vm565_vm4, %v2223_v17 }
  0x32   : > { %1982 = vmatprep.mubr.msk.bf16.mxu0 %vm2261_vm0, %v2260_v0 }
  0x34   : > { %2061 = vmatmul.mubr.msk.bf16.gmra.mrb[16].mxu1 %vm825_vm3, %v2239_v22 }
  0x35   : > { %2064 = vmatprep.mubr.msk.bf16.mxu1 %vm2261_vm0, %v2260_v0 }
  0x39   : > { %1983 = vmatmul.mubr.msk.bf16.gmra.mrb[8].mxu0 %vm565_vm4, %v2224_v19 }
  0x3a   : > { %1986 = vmatprep.mubr.msk.bf16.mxu0 %vm2261_vm0, %v2260_v0 }
  0x3c   : > { %2065 = vmatmul.mubr.msk.bf16.gmra.mrb[20].mxu1 %vm825_vm3, %v2240_v24 }
  0x3d   : > { %2068 = vmatprep.mubr.msk.bf16.mxu1 %vm2261_vm0, %v2260_v0 }
  0x41   : > { %1987 = vmatmul.mubr.msk.bf16.gmra.mrb[12].mxu0 %vm565_vm4, %v2225_v21 }
  0x42   : > { %1990 = vmatprep.mubr.msk.bf16.mxu0 %vm2261_vm0, %v2260_v0 }
  0x44   : > { %2069 = vmatmul.mubr.msk.bf16.gmra.mrb[24].mxu1 %vm825_vm3, %v2241_v26 }
  0x45   : > { %2072 = vmatprep.mubr.msk.bf16.mxu1 %vm2261_vm0, %v2260_v0 }
  0x49   : > { %1991 = vmatmul.mubr.msk.bf16.gmra.mrb[16].mxu0 %vm565_vm4, %v2226_v23 }
  0x4a   : > { %1994 = vmatprep.mubr.msk.bf16.mxu0 %vm2261_vm0, %v2260_v0 }
  0x4c   : > { %2073 = vmatmul.mubr.msk.bf16.gmra.mrb[28].mxu1 %vm825_vm3, %v2242_v28 }
  0x4d   : > { %2076 = vmatprep.mubr.msk.bf16.mxu1 %vm2261_vm0, %v2260_v0 }
  0x51   : > { %1995 = vmatmul.mubr.msk.bf16.gmra.mrb[20].mxu0 %vm565_vm4, %v2227_v25 }
  0x52   : > { %1998 = vmatprep.mubr.msk.bf16.mxu0 %vm2261_vm0, %v2260_v0 }
  0x54   : > { %2077 = vmatmul.mubr.msk.bf16.gmra.mrb[32].mxu1 %vm825_vm3, %v2243_v30 }
  0x55   : > { %2082 = vmatprep.mubr.msk.bf16.mxu1 %vm2261_vm0, %v2260_v0 }
  0x59   : > { %1999 = vmatmul.mubr.msk.bf16.gmra.mrb[24].mxu0 %vm565_vm4, %v2228_v27 }
  0x5a   : > { %2002 = vmatprep.mubr.msk.bf16.mxu0 %vm2261_vm0, %v2260_v0 }
  0x61   : > { %2003 = vmatmul.mubr.msk.bf16.gmra.mrb[28].mxu0 %vm565_vm4, %v2229_v29 }
  0x62   : > { %2006 = vmatprep.mubr.msk.bf16.mxu0 %vm2261_vm0, %v2260_v0 }
  0x69   : > { %2007 = vmatmul.mubr.msk.bf16.gmra.mrb[32].mxu0 %vm565_vm4, %v2230_v31 }
  0x6a   : > { %2010 = vmatprep.mubr.msk.bf16.mxu0 %vm2261_vm0, %v2260_v0 }
  0x71   : > { %2011 = vmatmul.mubr.msk.bf16.gmra.mrb[36].mxu0 %vm565_vm4, %v2231_v32 }
  0x72   : > { %2014 = vmatprep.mubr.msk.bf16.mxu0 %vm2261_vm0, %v2260_v0 }
  0x79   : > { %2015 = vmatmul.mubr.msk.bf16.gmra.mrb[40].mxu0 %vm565_vm4, %v2232_v33 }
  0x7a   : > { %2018 = vmatprep.mubr.msk.bf16.mxu0 %vm2261_vm0, %v2260_v0 }
  0x81   : > { %2019 = vmatmul.mubr.msk.bf16.gmra.mrb[44].mxu0 %vm565_vm4, %v2233_v34 }
  0x82   : > { %2022 = vmatprep.mubr.msk.bf16.mxu0 %vm2261_vm0, %v2260_v0 }
  0x89   : > { %2023 = vmatmul.mubr.msk.bf16.gmra.mrb[48].mxu0 %vm565_vm4, %v2234_v35 }
  0x8a   : > { %2028 = vmatprep.mubr.msk.bf16.mxu0 %vm2261_vm0, %v2260_v0 }
  0x91   : > { %2029 = vmatmul.mubr.msk.bf16.vlgmr.msra.gmra.mrb[52].mxu0 %vm825_vm3, %v2244_v36 }
  0x92   : > { %2032 = vmatprep.mubr.msk.bf16.mxu0 %vm2261_vm0, %v2260_v0 }
  0x99   : > { %2033 = vmatmul.mubr.msk.bf16.gmra.mrb[56].mxu0 %vm825_vm3, %v2245_v37 }
  0x9a   : > { %2036 = vmatprep.mubr.msk.bf16.mxu0 %vm2261_vm0, %v2260_v0 }
  0xa1   : > { %2037 = vmatmul.mubr.msk.bf16.gmra.mrb[60].mxu0 %vm825_vm3, %v2246_v38 }
  0xa2   : > { %2040 = vmatprep.mubr.msk.bf16.mxu0 %vm2261_vm0, %v2260_v0 }
  0xa9   : > { %2041 = vmatmul.mubr.msk.bf16.gmra.mrb[64].mxu0 %vm825_vm3, %v2247_v39 }
  0xaa   : > { %2136 = vmatprep.mubr.msk.f32.mxu0 %vm2261_vm0, %v2260_v0 }
  0xfc   : > { %v645_v40 = vpop.f32.mrb[0].mxu0 }
  0xfd   : > { %v1976_v41 = vpop.f32.mrb[1].mxu0 }
  0xfe   : > { %v648_v42 = vpop.f32.mrb[2].mxu0 }
  0xff   : > { %v747_v43 = vpack.c.bf16 %v648_v42, %v645_v40  ;;  %v1977_v44 = vpop.f32.mrb[3].mxu0 }
 0x101   : > { %2083 = vmatmul.mubr.msk.bf16.vlgmr.msra.gmra.mrb[36].mxu1 %vm825_vm3, %v747_v43 }
 0x102   : > { %2086 = vmatprep.mubr.msk.bf16.mxu1 %vm2261_vm0, %v2260_v0 }
 0x104   : > { %v653_v45 = vpop.f32.mrb[4].mxu0 }
 0x105   : > { %v1980_v46 = vpop.f32.mrb[5].mxu0 }
 0x106   : > { %v656_v47 = vpop.f32.mrb[6].mxu0 }
 0x107   : > { %v748_v48 = vpack.c.bf16 %v656_v47, %v653_v45  ;;  %v1981_v49 = vpop.f32.mrb[7].mxu0 }
 0x109   : > { %2087 = vmatmul.mubr.msk.bf16.gmra.mrb[40].mxu1 %vm825_vm3, %v748_v48 }
 0x10a   : > { %2090 = vmatprep.mubr.msk.bf16.mxu1 %vm2261_vm0, %v2260_v0 }
 0x10c   : > { %v661_v50 = vpop.f32.mrb[8].mxu0 }
 0x10d   : > { %v1984_v51 = vpop.f32.mrb[9].mxu0 }
 0x10e   : > { %v664_v52 = vpop.f32.mrb[10].mxu0 }
 0x10f   : > { %v749_v53 = vpack.c.bf16 %v664_v52, %v661_v50  ;;  %v1985_v54 = vpop.f32.mrb[11].mxu0 }
 0x111   : > { %2091 = vmatmul.mubr.msk.bf16.gmra.mrb[44].mxu1 %vm825_vm3, %v749_v53 }
 0x112   : > { %2094 = vmatprep.mubr.msk.bf16.mxu1 %vm2261_vm0, %v2260_v0 }
 0x114   : > { %v669_v55 = vpop.f32.mrb[12].mxu0 }
 0x115   : > { %v1988_v56 = vpop.f32.mrb[13].mxu0 }
 0x116   : > { %v672_v57 = vpop.f32.mrb[14].mxu0 }
 0x117   : > { %v750_v58 = vpack.c.bf16 %v672_v57, %v669_v55  ;;  %v1989_v59 = vpop.f32.mrb[15].mxu0 }
 0x119   : > { %2095 = vmatmul.mubr.msk.bf16.gmra.mrb[48].mxu1 %vm825_vm3, %v750_v58  ;;  %v1385_v58 = vld [vmem:[%s2859_s7] sm:$0xff] }
 0x11a   : > { %2098 = vmatprep.mubr.msk.bf16.mxu1 %vm2261_vm0, %v2260_v0  ;;  %2135 = vmatpush3.msra.mxu0 %v1385_v58 }
 0x11b   : > { %2139 = vmatprep.subr.mxu0 %v2260_v0 }
 0x11c   : > { %v677_v60 = vpop.f32.mrb[16].mxu0 }
 0x11d   : > { %v1992_v61 = vpop.f32.mrb[17].mxu0 }
 0x11e   : > { %v680_v62 = vpop.f32.mrb[18].mxu0 }
 0x11f   : > { %v751_v63 = vpack.c.bf16 %v680_v62, %v677_v60  ;;  %v1993_v1 = vpop.f32.mrb[19].mxu0 }
 0x121   : > { %2099 = vmatmul.mubr.msk.bf16.gmra.mrb[0].mxu1 %vm825_vm3, %v751_v63 }
 0x122   : > { %2102 = vmatprep.mubr.msk.bf16.mxu1 %vm2261_vm0, %v2260_v0 }
 0x124   : > { %v685_v2 = vpop.f32.mrb[20].mxu0 }
 0x125   : > { %v1996_v3 = vpop.f32.mrb[21].mxu0 }
 0x126   : > { %v688_v4 = vpop.f32.mrb[22].mxu0 }
 0x127   : > { %v752_v5 = vpack.c.bf16 %v688_v4, %v685_v2  ;;  %v1997_v6 = vpop.f32.mrb[23].mxu0 }
 0x129   : > { %2103 = vmatmul.mubr.msk.bf16.gmra.mrb[4].mxu1 %vm825_vm3, %v752_v5 }
 0x12a   : > { %2106 = vmatprep.mubr.msk.bf16.mxu1 %vm2261_vm0, %v2260_v0 }
 0x12c   : > { %v693_v7 = vpop.f32.mrb[24].mxu0 }
 0x12d   : > { %v2000_v8 = vpop.f32.mrb[25].mxu0 }
 0x12e   : > { %v696_v9 = vpop.f32.mrb[26].mxu0 }
 0x12f   : > { %v753_v10 = vpack.c.bf16 %v696_v9, %v693_v7  ;;  %v2001_v11 = vpop.f32.mrb[27].mxu0 }
 0x131   : > { %2107 = vmatmul.mubr.msk.bf16.gmra.mrb[8].mxu1 %vm825_vm3, %v753_v10 }
 0x132   : > { %2110 = vmatprep.mubr.msk.bf16.mxu1 %vm2261_vm0, %v2260_v0 }
 0x134   : > { %v701_v12 = vpop.f32.mrb[28].mxu0 }
 0x135   : > { %v2004_v13 = vpop.f32.mrb[29].mxu0 }
 0x136   : > { %v704_v14 = vpop.f32.mrb[30].mxu0 }
 0x137   : > { %v754_v15 = vpack.c.bf16 %v704_v14, %v701_v12  ;;  %v2005_v16 = vpop.f32.mrb[31].mxu0  ;;  %v2540_v14 = vld [vmem:[%s2857_s5] ss:$0 sm:$0xff] }
 0x139   : > { %2111 = vmatmul.mubr.msk.bf16.gmra.mrb[12].mxu1 %vm825_vm3, %v754_v15 }
 0x13a   : > { %2114 = vmatprep.mubr.msk.bf16.mxu1 %vm2261_vm0, %v2260_v0 }
 0x13c   : > { %v709_v17 = vpop.f32.mrb[32].mxu0 }
 0x13d   : > { %v2008_v18 = vpop.f32.mrb[33].mxu0 }
 0x13e   : > { %v712_v19 = vpop.f32.mrb[34].mxu0  ;;  %v2548_v18 = vld [vmem:[%s2858_s6] ss:$0 sm:$0xff] }
 0x13f   : > { %v755_v20 = vpack.c.bf16 %v712_v19, %v709_v17  ;;  %v2009_v21 = vpop.f32.mrb[35].mxu0 }
 0x141   : > { %2115 = vmatmul.mubr.msk.bf16.gmra.mrb[16].mxu1 %vm825_vm3, %v755_v20 }
 0x142   : > { %2118 = vmatprep.mubr.msk.bf16.mxu1 %vm2261_vm0, %v2260_v0 }
 0x144   : > { %v717_v22 = vpop.f32.mrb[36].mxu0 }
 0x145   : > { %v2012_v23 = vpop.f32.mrb[37].mxu0 }
 0x146   : > { %v720_v24 = vpop.f32.mrb[38].mxu0 }
 0x147   : > { %v756_v25 = vpack.c.bf16 %v720_v24, %v717_v22  ;;  %v2013_v26 = vpop.f32.mrb[39].mxu0 }
 0x149   : > { %2119 = vmatmul.mubr.msk.bf16.gmra.mrb[20].mxu1 %vm825_vm3, %v756_v25 }
 0x14a   : > { %2122 = vmatprep.mubr.msk.bf16.mxu1 %vm2261_vm0, %v2260_v0 }
 0x14c   : > { %v725_v27 = vpop.f32.mrb[40].mxu0 }
 0x14d   : > { %v2016_v28 = vpop.f32.mrb[41].mxu0 }
 0x14e   : > { %v728_v29 = vpop.f32.mrb[42].mxu0 }
 0x14f   : > { %v757_v30 = vpack.c.bf16 %v728_v29, %v725_v27  ;;  %v2017_v31 = vpop.f32.mrb[43].mxu0 }
 0x151   : > { %2123 = vmatmul.mubr.msk.bf16.gmra.mrb[24].mxu1 %vm825_vm3, %v757_v30 }
 0x152   : > { %2126 = vmatprep.mubr.msk.bf16.mxu1 %vm2261_vm0, %v2260_v0 }
 0x154   : > { %v733_v32 = vpop.f32.mrb[44].mxu0 }
 0x155   : > { %v2020_v33 = vpop.f32.mrb[45].mxu0 }
 0x156   : > { %v736_v34 = vpop.f32.mrb[46].mxu0 }
 0x157   : > { %v758_v35 = vpack.c.bf16 %v736_v34, %v733_v32  ;;  %v2021_v36 = vpop.f32.mrb[47].mxu0 }
 0x159   : > { %2127 = vmatmul.mubr.msk.bf16.gmra.mrb[28].mxu1 %vm825_vm3, %v758_v35 }
 0x15a   : > { %2130 = vmatprep.mubr.msk.bf16.mxu1 %vm2261_vm0, %v2260_v0 }
 0x15c   : > { %v741_v37 = vpop.f32.mrb[48].mxu0 }
 0x15d   : > { %v759_v38 = vpack.c.bf16 %v741_v37, %v741_v37  ;;  %v2024_v39 = vpop.f32.mrb[49].mxu0 }
 0x15e   : > { %v744_v40 = vpop.f32.mrb[50].mxu0 }
 0x15f   : > { %v2025_v41 = vpop.f32.mrb[51].mxu0 }
 0x161   : > { %2131 = vmatmul.mubr.msk.bf16.gmra.mrb[32].mxu1 %vm825_vm3, %v759_v38 }
 0x164   : > { %v903_v42 = vpop.f32.mrb[52].mxu0 }
 0x165   : > { %v2030_v43 = vpop.f32.mrb[53].mxu0 }
 0x166   : > { %v906_v44 = vpop.f32.mrb[54].mxu0 }
 0x167   : > { %v2031_v45 = vpop.f32.mrb[55].mxu0 }
 0x16c   : > { %v911_v46 = vpop.f32.mrb[56].mxu0 }
 0x16d   : > { %v2034_v47 = vpop.f32.mrb[57].mxu0 }
 0x16e   : > { %v914_v48 = vpop.f32.mrb[58].mxu0 }
 0x16f   : > { %v2035_v49 = vpop.f32.mrb[59].mxu0 }
 0x174   : > { %v919_v50 = vpop.f32.mrb[60].mxu0 }
 0x175   : > { %v2038_v51 = vpop.f32.mrb[61].mxu0 }
 0x176   : > { %v922_v52 = vpop.f32.mrb[62].mxu0 }
 0x177   : > { %v2039_v53 = vpop.f32.mrb[63].mxu0 }
 0x17c   : > { %v927_v54 = vpop.f32.mrb[64].mxu0 }
 0x17d   : > { %v2042_v55 = vpop.f32.mrb[65].mxu0 }
 0x17e   : > { %v930_v56 = vpop.f32.mrb[66].mxu0 }
 0x17f   : > { %v2043_v57 = vpop.f32.mrb[67].mxu0 }
 0x1d4   : > { %v1081_v59 = vpop.f32.mrb[36].mxu1 }
 0x1d5   : > { %v1082_v60 = vadd.f32 %v1081_v59, %v903_v42  ;;  %v2084_v61 = vpop.f32.mrb[37].mxu1 }
 0x1d6   : > { %v1084_v62 = vpop.f32.mrb[38].mxu1 }
 0x1d7   : > { %v1085_v63 = vadd.f32 %v1084_v62, %v906_v44  ;;  %v2085_v1 = vpop.f32.mrb[39].mxu1  ;;  %v1190_v16 = vmul.f32 %v2540_v14, %v1082_v60 }
 0x1d9   : > { %v1191_v15 = vmul.f32 %v2540_v14, %v1085_v63  ;;  %v1222_v24 = vadd.f32 %v2548_v18, %v1190_v16 }
 0x1db   : > { %v1223_v20 = vadd.f32 %v2548_v18, %v1191_v15  ;;  %v2557_v31 = vmax.f32 %v1222_v24, 0.0 }
 0x1dc   : > { %v1089_v2 = vpop.f32.mrb[40].mxu1 }
 0x1dd   : > { %v1090_v3 = vadd.f32 %v1089_v2, %v911_v46  ;;  %v2088_v4 = vpop.f32.mrb[41].mxu1  ;;  %v2554_v29 = vmax.f32 %v1223_v20, 0.0  ;;  %v1272_v40 = vsel %vm825_vm3, %v2557_v31, 0.0 }
 0x1de   : > { %v1092_v5 = vpop.f32.mrb[42].mxu1 }
 0x1df   : > { %v1093_v6 = vadd.f32 %v1092_v5, %v914_v48  ;;  %v2089_v7 = vpop.f32.mrb[43].mxu1  ;;  %v1192_v17 = vmul.f32 %v2540_v14, %v1090_v3  ;;  %v1273_v35 = vsel %vm825_vm3, %v2554_v29, 0.0 }
 0x1e0   : > { %v1274_v45 = vadd.f32 %v1273_v35, %v1272_v40 }
 0x1e1   : > { %v1224_v25 = vadd.f32 %v2548_v18, %v1192_v17  ;;  %v1193_v26 = vmul.f32 %v2540_v14, %v1093_v6 }
 0x1e3   : > { %v2559_v32 = vmax.f32 %v1224_v25, 0.0  ;;  %v1225_v33 = vadd.f32 %v2548_v18, %v1193_v26 }
 0x1e4   : > { %v1097_v8 = vpop.f32.mrb[44].mxu1 }
 0x1e5   : > { %v1098_v9 = vadd.f32 %v1097_v8, %v919_v50  ;;  %v2092_v10 = vpop.f32.mrb[45].mxu1  ;;  %v1275_v41 = vsel %vm825_vm3, %v2559_v32, 0.0  ;;  %v2570_v42 = vmax.f32 %v1225_v33, 0.0 }
 0x1e6   : > { %v1100_v11 = vpop.f32.mrb[46].mxu1  ;;  %v1276_v48 = vadd.f32 %v1275_v41, %v1274_v45 }
 0x1e7   : > { %v1101_v12 = vadd.f32 %v1100_v11, %v922_v52  ;;  %v2093_v13 = vpop.f32.mrb[47].mxu1  ;;  %v1194_v30 = vmul.f32 %v2540_v14, %v1098_v9  ;;  %v1277_v49 = vsel %vm825_vm3, %v2570_v42, 0.0 }
 0x1e8   : > { %v1278_v57 = vadd.f32 %v1277_v49, %v1276_v48 }
 0x1e9   : > { %v1226_v36 = vadd.f32 %v2548_v18, %v1194_v30  ;;  %v1195_v37 = vmul.f32 %v2540_v14, %v1101_v12 }
 0x1eb   : > { %v2573_v46 = vmax.f32 %v1226_v36, 0.0  ;;  %v1227_v47 = vadd.f32 %v2548_v18, %v1195_v37 }
 0x1ec   : > { %v1105_v19 = vpop.f32.mrb[48].mxu1 }
 0x1ed   : > { %v1106_v21 = vadd.f32 %v1105_v19, %v927_v54  ;;  %v2096_v22 = vpop.f32.mrb[49].mxu1  ;;  %v1279_v53 = vsel %vm825_vm3, %v2573_v46, 0.0  ;;  %v2582_v54 = vmax.f32 %v1227_v47, 0.0 }
 0x1ee   : > { %v1108_v23 = vpop.f32.mrb[50].mxu1  ;;  %v1280_v62 = vadd.f32 %v1279_v53, %v1278_v57 }
 0x1ef   : > { %v1109_v27 = vadd.f32 %v1108_v23, %v930_v56  ;;  %v2097_v28 = vpop.f32.mrb[51].mxu1  ;;  %v1196_v43 = vmul.f32 %v2540_v14, %v1106_v21  ;;  %v1281_v63 = vsel %vm825_vm3, %v2582_v54, 0.0 }
 0x1f0   : > { %v1282_v6 = vadd.f32 %v1281_v63, %v1280_v62 }
 0x1f1   : > { %v1228_v50 = vadd.f32 %v2548_v18, %v1196_v43  ;;  %v1197_v51 = vmul.f32 %v2540_v14, %v1109_v27 }
 0x1f3   : > { %v2585_v59 = vmax.f32 %v1228_v50, 0.0  ;;  %v1229_v60 = vadd.f32 %v2548_v18, %v1197_v51 }
 0x1f4   : > { %v1113_v34 = vpop.f32.mrb[0].mxu1 }
 0x1f5   : > { %v2100_v38 = vpop.f32.mrb[1].mxu1  ;;  %v1198_v55 = vmul.f32 %v2540_v14, %v1113_v34  ;;  %v1283_v3 = vsel %vm825_vm3, %v2585_v59, 0.0  ;;  %v2594_v4 = vmax.f32 %v1229_v60, 0.0 }
 0x1f6   : > { %v1116_v39 = vpop.f32.mrb[2].mxu1  ;;  %v1284_v11 = vadd.f32 %v1283_v3, %v1282_v6 }
 0x1f7   : > { %v2101_v44 = vpop.f32.mrb[3].mxu1  ;;  %v1230_v1 = vadd.f32 %v2548_v18, %v1198_v55  ;;  %v1199_v2 = vmul.f32 %v2540_v14, %v1116_v39  ;;  %v1285_v13 = vsel %vm825_vm3, %v2594_v4, 0.0 }
 0x1f8   : > { %v1286_v22 = vadd.f32 %v1285_v13, %v1284_v11 }
 0x1f9   : > { %v2597_v8 = vmax.f32 %v1230_v1, 0.0  ;;  %v1231_v9 = vadd.f32 %v2548_v18, %v1199_v2 }
 0x1fb   : > { %v1287_v19 = vsel %vm825_vm3, %v2597_v8, 0.0  ;;  %v2606_v20 = vmax.f32 %v1231_v9, 0.0 }
 0x1fc   : > { %v1121_v52 = vpop.f32.mrb[4].mxu1  ;;  %v1288_v25 = vadd.f32 %v1287_v19, %v1286_v22 }
 0x1fd   : > { %v2104_v56 = vpop.f32.mrb[5].mxu1  ;;  %v1200_v5 = vmul.f32 %v2540_v14, %v1121_v52  ;;  %v1289_v27 = vsel %vm825_vm3, %v2606_v20, 0.0 }
 0x1fe   : > { %v1124_v58 = vpop.f32.mrb[6].mxu1  ;;  %v1290_v39 = vadd.f32 %v1289_v27, %v1288_v25 }
 0x1ff   : > { %v2105_v61 = vpop.f32.mrb[7].mxu1  ;;  %v1232_v15 = vadd.f32 %v2548_v18, %v1200_v5  ;;  %v1201_v16 = vmul.f32 %v2540_v14, %v1124_v58 }
 0x201   : > { %v2609_v23 = vmax.f32 %v1232_v15, 0.0  ;;  %v1233_v24 = vadd.f32 %v2548_v18, %v1201_v16 }
 0x203   : > { %v1291_v35 = vsel %vm825_vm3, %v2609_v23, 0.0  ;;  %v2618_v36 = vmax.f32 %v1233_v24, 0.0 }
 0x204   : > { %v1129_v7 = vpop.f32.mrb[8].mxu1  ;;  %v1292_v43 = vadd.f32 %v1291_v35, %v1290_v39 }
 0x205   : > { %v2108_v10 = vpop.f32.mrb[9].mxu1  ;;  %v1202_v21 = vmul.f32 %v2540_v14, %v1129_v7  ;;  %v1293_v44 = vsel %vm825_vm3, %v2618_v36, 0.0 }
 0x206   : > { %v1132_v12 = vpop.f32.mrb[10].mxu1  ;;  %v1294_v53 = vadd.f32 %v1293_v44, %v1292_v43 }
 0x207   : > { %v2109_v17 = vpop.f32.mrb[11].mxu1  ;;  %v1234_v28 = vadd.f32 %v2548_v18, %v1202_v21  ;;  %v1203_v30 = vmul.f32 %v2540_v14, %v1132_v12 }
 0x209   : > { %v2621_v40 = vmax.f32 %v1234_v28, 0.0  ;;  %v1235_v41 = vadd.f32 %v2548_v18, %v1203_v30 }
 0x20b   : > { %v1295_v49 = vsel %vm825_vm3, %v2621_v40, 0.0  ;;  %v2630_v50 = vmax.f32 %v1235_v41, 0.0 }
 0x20c   : > { %v1137_v26 = vpop.f32.mrb[12].mxu1  ;;  %v1296_v60 = vadd.f32 %v1295_v49, %v1294_v53  ;;  %v1336_v49 = vsel %vm825_vm3, %v2582_v54, -inf  ;;  %v1330_v53 = vsel %vm825_vm3, %v2557_v31, -inf }
 0x20d   : > { %v2112_v33 = vpop.f32.mrb[13].mxu1  ;;  %v1204_v37 = vmul.f32 %v2540_v14, %v1137_v26  ;;  %v1297_v61 = vsel %vm825_vm3, %v2630_v50, 0.0 }
 0x20e   : > { %v1140_v34 = vpop.f32.mrb[14].mxu1  ;;  %v1298_v3 = vadd.f32 %v1297_v61, %v1296_v60 }
 0x20f   : > { %v2113_v38 = vpop.f32.mrb[15].mxu1  ;;  %v1236_v45 = vadd.f32 %v2548_v18, %v1204_v37  ;;  %v1205_v47 = vmul.f32 %v2540_v14, %v1140_v34 }
 0x211   : > { %v2633_v56 = vmax.f32 %v1236_v45, 0.0  ;;  %v1237_v57 = vadd.f32 %v2548_v18, %v1205_v47  ;;  %v1334_v47 = vsel %vm825_vm3, %v2573_v46, -inf }
 0x212   : > { %v1335_v61 = vmax.f32 %v1330_v53, %v1334_v47 }
 0x213   : > { %v1299_v1 = vsel %vm825_vm3, %v2633_v56, 0.0  ;;  %v2642_v2 = vmax.f32 %v1237_v57, 0.0  ;;  %v1332_v57 = vsel %vm825_vm3, %v2559_v32, -inf  ;;  %v1354_v53 = vsel %vm825_vm3, %v2633_v56, -inf }
 0x214   : > { %v1145_v48 = vpop.f32.mrb[16].mxu1  ;;  %v1300_v11 = vadd.f32 %v1299_v1, %v1298_v3 }
 0x215   : > { %v1206_v51 = vmul.f32 %v2540_v14, %v1145_v48  ;;  %v2116_v52 = vpop.f32.mrb[17].mxu1  ;;  %v1301_v13 = vsel %vm825_vm3, %v2642_v2, 0.0 }
 0x216   : > { %v1148_v55 = vpop.f32.mrb[18].mxu1  ;;  %v1302_v22 = vadd.f32 %v1301_v13, %v1300_v11  ;;  %v1344_v13 = vsel %vm825_vm3, %v2606_v20, -inf }
 0x217   : > { %v2117_v58 = vpop.f32.mrb[19].mxu1  ;;  %v1238_v62 = vadd.f32 %v2548_v18, %v1206_v51  ;;  %v1207_v63 = vmul.f32 %v2540_v14, %v1148_v55  ;;  %v1338_v51 = vsel %vm825_vm3, %v2585_v59, -inf  ;;  %v1331_v55 = vsel %vm825_vm3, %v2554_v29, -inf }
 0x218   : > { %v1333_v58 = vsel %vm825_vm3, %v2570_v42, -inf }
 0x219   : > { %v2644_v6 = vmax.f32 %v1238_v62, 0.0  ;;  %v1239_v7 = vadd.f32 %v2548_v18, %v1207_v63 }
 0x21b   : > { %v1303_v19 = vsel %vm825_vm3, %v2644_v6, 0.0  ;;  %v2654_v21 = vmax.f32 %v1239_v7, 0.0  ;;  %v1337_v7 = vmax.f32 %v1331_v55, %v1336_v49  ;;  %v1358_v55 = vsel %vm825_vm3, %v2644_v6, -inf }
 0x21c   : > { %v1153_v5 = vpop.f32.mrb[20].mxu1  ;;  %v1304_v26 = vadd.f32 %v1303_v19, %v1302_v22  ;;  %v1346_v19 = vsel %vm825_vm3, %v2609_v23, -inf  ;;  %v1348_v22 = vsel %vm825_vm3, %v2618_v36, -inf }
 0x21d   : > { %v1208_v9 = vmul.f32 %v2540_v14, %v1153_v5  ;;  %v2120_v10 = vpop.f32.mrb[21].mxu1  ;;  %v1305_v28 = vsel %vm825_vm3, %v2654_v21, 0.0  ;;  %v1340_v5 = vsel %vm825_vm3, %v2594_v4, -inf }
 0x21e   : > { %v1156_v12 = vpop.f32.mrb[22].mxu1  ;;  %v1306_v43 = vadd.f32 %v1305_v28, %v1304_v26 }
 0x21f   : > { %v1240_v15 = vadd.f32 %v2548_v18, %v1208_v9  ;;  %v1209_v16 = vmul.f32 %v2540_v14, %v1156_v12  ;;  %v2121_v17 = vpop.f32.mrb[23].mxu1  ;;  %v1339_v9 = vmax.f32 %v1332_v57, %v1338_v51  ;;  %v1342_v12 = vsel %vm825_vm3, %v2597_v8, -inf }
 0x221   : > { %v2656_v24 = vmax.f32 %v1240_v15, 0.0  ;;  %v1241_v25 = vadd.f32 %v2548_v18, %v1209_v16 }
 0x223   : > { %v1307_v35 = vsel %vm825_vm3, %v2656_v24, 0.0  ;;  %v2664_v37 = vmax.f32 %v1241_v25, 0.0  ;;  %v1350_v25 = vsel %vm825_vm3, %v2621_v40, -inf }
 0x224   : > { %v1161_v27 = vpop.f32.mrb[24].mxu1  ;;  %v1308_v48 = vadd.f32 %v1307_v35, %v1306_v43  ;;  %v1345_v35 = vmax.f32 %v1337_v7, %v1344_v13 }
 0x225   : > { %v1210_v30 = vmul.f32 %v2540_v14, %v1161_v27  ;;  %v2124_v33 = vpop.f32.mrb[25].mxu1  ;;  %v1309_v52 = vsel %vm825_vm3, %v2664_v37, 0.0  ;;  %v1352_v27 = vsel %vm825_vm3, %v2630_v50, -inf  ;;  %v1364_v57 = vsel %vm825_vm3, %v2664_v37, -inf }
 0x226   : > { %v1164_v34 = vpop.f32.mrb[26].mxu1  ;;  %v1310_v10 = vadd.f32 %v1309_v52, %v1308_v48  ;;  %v1353_v49 = vmax.f32 %v1345_v35, %v1352_v27 }
 0x227   : > { %v1242_v38 = vadd.f32 %v2548_v18, %v1210_v30  ;;  %v1211_v39 = vmul.f32 %v2540_v14, %v1164_v34  ;;  %v2125_v41 = vpop.f32.mrb[27].mxu1  ;;  %v1343_v34 = vmax.f32 %v1335_v61, %v1342_v12 }
 0x228   : > { %v1356_v41 = vsel %vm825_vm3, %v2642_v2, -inf }
 0x229   : > { %v2668_v44 = vmax.f32 %v1242_v38, 0.0  ;;  %v1243_v45 = vadd.f32 %v2548_v18, %v1211_v39  ;;  %v1341_v38 = vmax.f32 %v1333_v58, %v1340_v5  ;;  %v1347_v39 = vmax.f32 %v1339_v9, %v1346_v19 }
 0x22a   : > { %v1351_v48 = vmax.f32 %v1343_v34, %v1350_v25 }
 0x22b   : > { %v1311_v62 = vsel %vm825_vm3, %v2668_v44, 0.0  ;;  %v2689_v63 = vmax.f32 %v1243_v45, 0.0  ;;  %v1349_v47 = vmax.f32 %v1341_v38, %v1348_v22  ;;  %v1366_v7 = vsel %vm825_vm3, %v2668_v44, -inf }
 0x22c   : > { %v1169_v60 = vpop.f32.mrb[28].mxu1  ;;  %v1312_v26 = vadd.f32 %v1311_v62, %v1310_v10  ;;  %v1360_v62 = vsel %vm825_vm3, %v2654_v21, -inf  ;;  %v1355_v12 = vmax.f32 %v1347_v39, %v1354_v53  ;;  %v1359_v13 = vmax.f32 %v1351_v48, %v1358_v55 }
 0x22d   : > { %v1212_v1 = vmul.f32 %v2540_v14, %v1169_v60  ;;  %v2128_v3 = vpop.f32.mrb[29].mxu1  ;;  %v1313_v28 = vsel %vm825_vm3, %v2689_v63, 0.0  ;;  %v1357_v61 = vmax.f32 %v1349_v47, %v1356_v41 }
 0x22e   : > { %v1172_v11 = vpop.f32.mrb[30].mxu1  ;;  %v1314_v51 = vadd.f32 %v1313_v28, %v1312_v26  ;;  %v1367_v26 = vmax.f32 %v1359_v13, %v1366_v7  ;;  %v1536_v7 = vld [vmem:[%s2862_s10] sm:$0xf] }
 0x22f   : > { %v1244_v15 = vadd.f32 %v2548_v18, %v1212_v1  ;;  %v1213_v16 = vmul.f32 %v2540_v14, %v1172_v11  ;;  %v2129_v17 = vpop.f32.mrb[31].mxu1  ;;  %v1362_v1 = vsel %vm825_vm3, %v2656_v24, -inf  ;;  %v1460_v13 = vld [vmem:[%s2860_s8] sm:$0xf] }
 0x230   : > { %v1368_v17 = vsel %vm825_vm3, %v2689_v63, -inf  ;;  %v1363_v25 = vmax.f32 %v1355_v12, %v1362_v1  ;;  %v1461_v1 = vld [vmem:[%s2861_s9] sm:$0xff] }
 0x231   : > { %v2710_v30 = vmax.f32 %v1244_v15, 0.0  ;;  %v1245_v33 = vadd.f32 %v2548_v18, %v1213_v16  ;;  %v1365_v15 = vmax.f32 %v1357_v61, %v1364_v57  ;;  %v1361_v16 = vmax.f32 %v1353_v49, %v1360_v62 }
 0x233   : > { %v1315_v43 = vsel %vm825_vm3, %v2710_v30, 0.0  ;;  %v2717_v45 = vmax.f32 %v1245_v33, 0.0  ;;  %v1370_v19 = vsel %vm825_vm3, %v2710_v30, -inf  ;;  %v1369_v34 = vmax.f32 %v1361_v16, %v1368_v17 }
 0x234   : > { %v1177_v52 = vpop.f32.mrb[32].mxu1  ;;  %v1316_v3 = vadd.f32 %v1315_v43, %v1314_v51  ;;  %v1371_v35 = vmax.f32 %v1363_v25, %v1370_v19 }
 0x235   : > { %v1214_v58 = vmul.f32 %v2540_v14, %v1177_v52  ;;  %v2132_v60 = vpop.f32.mrb[33].mxu1  ;;  %v1317_v9 = vsel %vm825_vm3, %v2717_v45, 0.0  ;;  %v1372_v10 = vsel %vm825_vm3, %v2717_v45, -inf }
 0x236   : > { %v1180_v5 = vpop.f32.mrb[34].mxu1  ;;  %v1318_v27 = vadd.f32 %v1317_v9, %v1316_v3  ;;  %v1373_v28 = vmax.f32 %v1365_v15, %v1372_v10 }
 0x237   : > { %v1246_v14 = vadd.f32 %v2548_v18, %v1214_v58  ;;  %v2133_v11 = vpop.f32.mrb[35].mxu1 }
 0x238   : > { %v1377_v41 = vmax.f32 %v1371_v35, %v1373_v28 }
 0x239   : > { %v2741_v22 = vmax.f32 %v1246_v14, 0.0 }
 0x23b   : > { %v1320_v18 = vsel %vm1319_vm5, %v2741_v22, 0.0  ;;  %v1374_v33 = vsel %vm1319_vm5, %v2741_v22, -inf }
 0x23c   : > { %v1321_v38 = vadd.f32 %v1320_v18, %v1318_v27  ;;  %v1375_v39 = vmax.f32 %v1367_v26, %v1374_v33  ;;  %v1696_v27 = vlaneseq }
 0x23e   : > { %v1322_v43 = vrot.slane %v1321_v38, 4  ;;  %v1376_v47 = vmax.f32 %v1375_v39, %v1369_v34  ;;  %v1697_v28 = vshrl.u32 %v1696_v27, 7 }
 0x240   : > { %v1323_v48 = vadd.f32 %v1322_v43, %v1321_v38  ;;  %v1378_v49 = vmax.f32 %v1376_v47, %v1377_v41  ;;  %v1698_v18 = vsub.s32 0, %v1697_v28 }
 0x242   : > { %v1324_v51 = vrot.slane %v1323_v48, 2  ;;  %v1379_v52 = vrot.slane %v1378_v49, 4 }
 0x244   : > { %v1325_v53 = vadd.f32 %v1324_v51, %v1323_v48  ;;  %v1380_v55 = vmax.f32 %v1378_v49, %v1379_v52 }
 0x246   : > { %v1326_v57 = vrot.slane %v1325_v53, 1  ;;  %v1381_v58 = vrot.slane %v1380_v55, 2 }
 0x248   : > { %v1327_v60 = vadd.f32 %v1326_v57, %v1325_v53  ;;  %v1382_v61 = vmax.f32 %v1380_v55, %v1381_v58 }
 0x24a   : > { %v1329_v62 = vmul.f32 0.0051020407, %v1327_v60  ;;  %v1383_v3 = vrot.slane %v1382_v61, 1 }
 0x24c   : > { %2137 = vmatmul.mubr.msk.f32.vlgmr.msra.gmra.mrb[68].mxu0 %vm825_vm3, %v1329_v62  ;;  %v1384_v5 = vmax.f32 %v1382_v61, %v1383_v3 }
 0x24d   : > { %2140 = vmatpush3.msra.mxu0 %v1461_v1  ;;  %2141 = vmatprep.mubr.msk.f32.mxu0 %vm2261_vm0, %v2260_v0 }
 0x24e   : > { %2144 = vmatprep.subr.mxu0 %v2260_v0 }
 0x250   : > { %2142 = vmatmul.mubr.msk.f32.vlgmr.msra.gmra.mrb[70].mxu0 %vm825_vm3, %v1384_v5 }
 0x251   : > { %2146 = vmatprep.mubr.msk.f32.mxu0 %vm2261_vm0, %v2260_v0  ;;  %2145 = vmatpush3.msk.msra.mxu0 %vm865_vm2, %v1536_v7 }
 0x252   : > { %2149 = vmatprep.subr.mxu0 %v2260_v0 }
 0x31f   : > { %v1455_v9 = vpop.f32.mrb[68].mxu0 }
 0x320   : > { %v2138_v10 = vpop.f32.mrb[69].mxu0  ;;  %v1459_v15 = vmax.f32 %v1455_v9, 0.0 }
 0x323   : > { %v1531_v14 = vpop.f32.mrb[70].mxu0 }
 0x324   : > { %v1535_v11 = vmax.f32 %v1531_v14, 0.0  ;;  %v2143_v12 = vpop.f32.mrb[71].mxu0 }
 0x326   : > { %2147 = vmatmul.mubr.msk.f32.vlgmr.msra.gmra.mrb[72].mxu0 %vm1537_vm6, %v1535_v11 }
 0x327   : > { %2150 = vmatpush3.msk.msra.mxu0 %vm865_vm2, %v1460_v13  ;;  %2151 = vmatprep.mubr.msk.f32.mxu0 %vm2261_vm0, %v2260_v0 }
 0x32e   : > { %2152 = vmatmul.mubr.msk.f32.vlgmr.msra.gmra.mrb[72].mxu0 %vm1537_vm6, %v1459_v15 }
 0x401   : > { %v1686_v16 = vpop.f32.mrb[72].mxu0 }
 0x402   : > { %v1904_v17 = vmul.f32 -1.442695, %v1686_v16  ;;  %v2153_v19 = vpop.f32.mrb[73].mxu0 }
 0x404   : > { %2248 = vpow2.f32 %v1904_v17 }
 0x40e   : > { %v2249_v25 = vpop.eup %2248 }
 0x40f   : > { %v1693_v26 = vadd.f32 1.0, %v2249_v25 }
 0x411   : > { %2250 = vrcp.f32 %v1693_v26 }
 0x41b   : > { %v2251_v33 = vpop.eup %2250 }
 0x41c   : > { %v1699_v34 = vrot.slane %v2251_v33, %v1698_v18 }
 0x41e   : > { %v1700_v0 = vmul.f32 %v1699_v34, %v2557_v31  ;;  %v1701_v35 = vmul.f32 %v1699_v34, %v2554_v29  ;;  %v1702_v38 = vmul.f32 %v1699_v34, %v2559_v32  ;;  %v1703_v39 = vmul.f32 %v1699_v34, %v2570_v42 }
 0x41f   : > { %v1704_v41 = vmul.f32 %v1699_v34, %v2573_v46  ;;  %v1705_v43 = vmul.f32 %v1699_v34, %v2582_v54  ;;  %v1706_v47 = vmul.f32 %v1699_v34, %v2585_v59  ;;  %v1707_v48 = vmul.f32 %v1699_v34, %v2594_v4 }
 0x420   : > { %v1708_v31 = vmul.f32 %v1699_v34, %v2597_v8  ;;  %v1709_v29 = vmul.f32 %v1699_v34, %v2606_v20  ;;  %v1710_v32 = vmul.f32 %v1699_v34, %v2609_v23  ;;  %v1711_v42 = vmul.f32 %v1699_v34, %v2618_v36  ;;  %1725 = vst.msk [vmem:[%s2772_s22] sm:$0xff] %vm825_vm3, %v1700_v0 }
 0x421   : > { %1726 = vst.msk [vmem:[%s2772_s22 + $0x8] sm:$0xff] %vm825_vm3, %v1701_v35  ;;  %1727 = vst.msk [vmem:[%s2772_s22 + $0x10] sm:$0xff] %vm825_vm3, %v1702_v38  ;;  %v1712_v46 = vmul.f32 %v1699_v34, %v2621_v40  ;;  %v1713_v54 = vmul.f32 %v1699_v34, %v2630_v50  ;;  %v1714_v59 = vmul.f32 %v1699_v34, %v2633_v56 }
 0x422   : > { %1728 = vst.msk [vmem:[%s2772_s22 + $0x18] sm:$0xff] %vm825_vm3, %v1703_v39  ;;  %v1715_v4 = vmul.f32 %v1699_v34, %v2642_v2  ;;  %1729 = vst.msk [vmem:[%s2772_s22 + $0x20] sm:$0xff] %vm825_vm3, %v1704_v41  ;;  %v1716_v8 = vmul.f32 %v1699_v34, %v2644_v6  ;;  %v1717_v20 = vmul.f32 %v1699_v34, %v2654_v21 }
 0x423   : > { %1730 = vst.msk [vmem:[%s2772_s22 + $0x28] sm:$0xff] %vm825_vm3, %v1705_v43  ;;  %1731 = vst.msk [vmem:[%s2772_s22 + $0x30] sm:$0xff] %vm825_vm3, %v1706_v47  ;;  %v1718_v23 = vmul.f32 %v1699_v34, %v2656_v24  ;;  %v1719_v36 = vmul.f32 %v1699_v34, %v2664_v37  ;;  %v1720_v40 = vmul.f32 %v1699_v34, %v2668_v44 }
 0x424   : > { %1732 = vst.msk [vmem:[%s2772_s22 + $0x38] sm:$0xff] %vm825_vm3, %v1707_v48  ;;  %1733 = vst.msk [vmem:[%s2772_s22 + $0x40] sm:$0xff] %vm825_vm3, %v1708_v31  ;;  %v1721_v50 = vmul.f32 %v1699_v34, %v2689_v63  ;;  %v1722_v56 = vmul.f32 %v1699_v34, %v2710_v30  ;;  %v1723_v2 = vmul.f32 %v1699_v34, %v2717_v45 }
 0x425   : > { %1734 = vst.msk [vmem:[%s2772_s22 + $0x48] sm:$0xff] %vm825_vm3, %v1709_v29  ;;  %1735 = vst.msk [vmem:[%s2772_s22 + $0x50] sm:$0xff] %vm825_vm3, %v1710_v32  ;;  %v1724_v6 = vmul.f32 %v1699_v34, %v2741_v22 }
 0x426   : > { %1736 = vst.msk [vmem:[%s2772_s22 + $0x58] sm:$0xff] %vm825_vm3, %v1711_v42  ;;  %1737 = vst.msk [vmem:[%s2772_s22 + $0x60] sm:$0xff] %vm825_vm3, %v1712_v46 }
 0x427   : > { %1738 = vst.msk [vmem:[%s2772_s22 + $0x68] sm:$0xff] %vm825_vm3, %v1713_v54  ;;  %1739 = vst.msk [vmem:[%s2772_s22 + $0x70] sm:$0xff] %vm825_vm3, %v1714_v59 }
 0x428   : > { %1740 = vst.msk [vmem:[%s2772_s22 + $0x78] sm:$0xff] %vm825_vm3, %v1715_v4  ;;  %1741 = vst.msk [vmem:[%s2772_s22 + $0x80] sm:$0xff] %vm825_vm3, %v1716_v8 }
 0x429   : > { %1742 = vst.msk [vmem:[%s2772_s22 + $0x88] sm:$0xff] %vm825_vm3, %v1717_v20  ;;  %1743 = vst.msk [vmem:[%s2772_s22 + $0x90] sm:$0xff] %vm825_vm3, %v1718_v23 }
 0x42a   : > { %1744 = vst.msk [vmem:[%s2772_s22 + $0x98] sm:$0xff] %vm825_vm3, %v1719_v36  ;;  %1745 = vst.msk [vmem:[%s2772_s22 + $0xa0] sm:$0xff] %vm825_vm3, %v1720_v40 }
 0x42b   : > { %1746 = vst.msk [vmem:[%s2772_s22 + $0xa8] sm:$0xff] %vm825_vm3, %v1721_v50  ;;  %1747 = vst.msk [vmem:[%s2772_s22 + $0xb0] sm:$0xff] %vm825_vm3, %v1722_v56 }
 0x42c   : > { %1748 = vst.msk [vmem:[%s2772_s22 + $0xb8] sm:$0xff] %vm825_vm3, %v1723_v2 }
 0x42d   : > { %1749 = vst.msk [vmem:[%s2772_s22 + $0xc0] sm:$0xf] %vm1319_vm5, %v1724_v6 }
 0x42e PF: > { %s21_s17 = sadd.s32 1, %s2258_s17  }
 0x42f   : > { %p18_p4 = scmp.ge.s32.totalorder %s21_s17, 4  }
 0x431   :  { %20 = sbr.rel (!%p18_p4) target bundleno = 1 (0x1), region = 97 }

</bundles_post_ra>
